<compile_context>
chip_gen: v7x
topology: tpu7x:2x2x1
jax: 0.10.0
libtpu: 0.0.40
codegen_flags: <defaults>
</compile_context>

<pallas_src>
import jax
import jax.numpy as jnp
from jax import lax
from jax.experimental import pallas as pl
from jax.experimental.pallas import tpu as pltpu


def _classifier_kernel(x_ref, w_ref, b_ref, o_ref, acc_ref):
    # x_ref: (B, tk)    activation K-tile (tiny)
    # w_ref: (tn, tk)   contiguous row/col tile of the PyTorch-layout weight (N, K)
    # b_ref: (1, tn)    bias tile (tiny)
    # o_ref: (B, tn)    lane-dense output tile, resident across the K axis
    # acc_ref: (B, tn)  f32 accumulator scratch
    k = pl.program_id(1)

    @pl.when(k == 0)
    def _():
        acc_ref[...] = jnp.zeros_like(acc_ref)

    acc_ref[...] += lax.dot_general(
        x_ref[...], w_ref[...],
        dimension_numbers=(((1,), (1,)), ((), ())),   # x @ W^T over this K tile
        preferred_element_type=jnp.float32,           # f32 accumulate on the MXU
    )

    @pl.when(k == pl.num_programs(1) - 1)
    def _():
        o_ref[...] = (acc_ref[...] + b_ref[...].astype(jnp.float32)).astype(o_ref.dtype)


def _vmem_capacity_bytes():
    """Physical VMEM of the local chip; conservative 64 MiB (v7x) fallback."""
    try:
        return int(pltpu.get_tpu_info().vmem_capacity_bytes)
    except Exception:  # best-effort hardware query
        return 64 * 1024 * 1024


def _vmem_need(B, tn, tk, x_bytes, w_bytes):
    return (2 * tn * tk * w_bytes      # weight tile, double-buffered (dominant)
            + 2 * B * tk * x_bytes     # x tile, double-buffered
            + 2 * B * tn * 4           # f32 output tile, double-buffered
            + 2 * tn * 4               # bias tile, double-buffered
            + B * tn * 4)              # f32 accumulator scratch


def _pick_tiles(B, K, N, x_bytes, w_bytes):
    """Lane-dense tn and the largest legal K tile whose double-buffered working
    set fits comfortably in this chip's VMEM."""
    budget = int(0.6 * _vmem_capacity_bytes())

    # Output / bias are tiny, so tn=512 is plenty of lane density.
    tn = next((t for t in (512, 256, 128) if N % t == 0), N)

    # Legal K tiles: full K, or any divisor of K that is a multiple of 128
    # (the (8,128) BlockSpec constraint), largest first.
    tk_cands = [K]
    tk_cands += [t for t in range((K // 128) * 128, 127, -128)
                 if t != K and K % t == 0]

    for tk in tk_cands:
        if _vmem_need(B, tn, tk, x_bytes, w_bytes) <= budget:
            return tn, tk

    # Fall back: smallest K tile, then shrink tn.
    tk = tk_cands[-1]
    while (_vmem_need(B, tn, tk, x_bytes, w_bytes) > budget
           and tn > 128 and N % (tn // 2) == 0):
        tn //= 2
    return tn, tk


def prepare_params(weight, bias, param_dtype=jnp.float32):
    """One-time (init-time) parameter prep.  Keeps the PyTorch (N, K) layout;
    optionally stores the big weight in bf16 to halve the HBM stream
    (accumulation in the kernel stays f32)."""
    return weight.astype(param_dtype), bias.astype(jnp.float32)


def classifier_forward(x, weight, bias, *, tile_n=None, tile_k=None):
    """Forward of Classifier_Module (eval mode): Dropout(identity) -> Linear.

    x:      (B, K)  float32
    weight: (N, K)  PyTorch nn.Linear layout, float32 or bfloat16
    bias:   (N,)    float32
    returns (B, N)  float32
    """
    B, K = x.shape
    N, Kw = weight.shape
    assert Kw == K, (weight.shape, x.shape)
    assert bias.shape == (N,)
    assert N % 128 == 0, "out_features must be lane-aligned (multiple of 128)"

    # Feed the MXU both operands in the weight's storage dtype; casting x is
    # O(B*K) and negligible next to the O(N*K) weight stream.
    if x.dtype != weight.dtype:
        x = x.astype(weight.dtype)

    x_bytes = jnp.dtype(x.dtype).itemsize
    w_bytes = jnp.dtype(weight.dtype).itemsize

    tn_auto, tk_auto = _pick_tiles(B, K, N, x_bytes, w_bytes)
    tn = tile_n if tile_n is not None else tn_auto
    tk = tile_k if tile_k is not None else tk_auto
    assert N % tn == 0 and tn % 128 == 0
    assert K % tk == 0 and (tk % 128 == 0 or tk == K)

    vmem_cap = _vmem_capacity_bytes()
    vmem_need = _vmem_need(B, tn, tk, x_bytes, w_bytes)
    vmem_limit = int(min(max(vmem_need + (16 << 20), 48 << 20), 0.9 * vmem_cap))

    b2 = bias.reshape(1, N).astype(jnp.float32)

    cost = pl.CostEstimate(
        flops=2 * B * K * N,
        transcendentals=0,
        bytes_accessed=N * K * w_bytes + B * K * x_bytes * (N // tn)
                       + B * N * 4 + N * 4,
    )

    return pl.pallas_call(
        _classifier_kernel,
        out_shape=jax.ShapeDtypeStruct((B, N), jnp.float32),
        grid_spec=pltpu.PrefetchScalarGridSpec(
            num_scalar_prefetch=0,
            grid=(N // tn, K // tk),                       # reduction axis last
            in_specs=[
                pl.BlockSpec((B, tk), lambda j, k: (0, k)),   # x K-tile (tiny)
                pl.BlockSpec((tn, tk), lambda j, k: (j, k)),  # W tile: contiguous rows
                pl.BlockSpec((1, tn), lambda j, k: (0, j)),   # bias tile (tiny)
            ],
            out_specs=pl.BlockSpec((B, tn), lambda j, k: (0, j)),
            scratch_shapes=[pltpu.VMEM((B, tn), jnp.float32)],
        ),
        compiler_params=pltpu.CompilerParams(
            dimension_semantics=("parallel", "arbitrary"),
            vmem_limit_bytes=vmem_limit,
        ),
        cost_estimate=cost,
    )(x, weight, b2)


if __name__ == "__main__":
    # Small shapes consistent with the module's forward:
    #   original: in_features = 512*7*7 = 25088, out_features = 4096
    #   scaled:   in_features =  32*7*7 =  1568, out_features =  512, batch = 2
    B = 2
    C, H, W = 32, 7, 7
    K = C * H * W          # 1568
    N_OUT = 512

    key = jax.random.PRNGKey(0)
    kx, kw, kb = jax.random.split(key, 3)

    x = jax.random.normal(kx, (B, K), dtype=jnp.float32)
    bound = 1.0 / (K ** 0.5)
    weight = jax.random.uniform(kw, (N_OUT, K), jnp.float32, -bound, bound)
    bias = jax.random.uniform(kb, (N_OUT,), jnp.float32, -bound, bound)

    # Reference (eval-mode dropout == identity).
    ref = jnp.dot(x, weight.T, precision=lax.Precision.HIGHEST) + bias

    # f32 path: exact module semantics (single K step here since 1568 has no
    # 128-aligned divisor; full-size K=25088 runs the multi-step K pipeline).
    w32, b32 = prepare_params(weight, bias, jnp.float32)
    out = jax.block_until_ready(classifier_forward(x, w32, b32))
    assert out.shape == (B, N_OUT)
    assert jnp.allclose(out, ref, atol=1e-3, rtol=1e-3)

    # bf16-weight path: one-time init cast halves the HBM weight stream; f32 accumulate.
    wbf, bbf = prepare_params(weight, bias, jnp.bfloat16)
    out_bf = jax.block_until_ready(classifier_forward(x, wbf, bbf))
    assert out_bf.shape == (B, N_OUT) and out_bf.dtype == jnp.float32
    assert jnp.allclose(out_bf, ref, atol=5e-2, rtol=5e-2)

    # Exercise the multi-tile (N and K) accumulation path with 128-aligned K.
    K2, N2 = 1024, 256
    x2 = jax.random.normal(jax.random.PRNGKey(1), (B, K2), dtype=jnp.float32)
    w2 = jax.random.uniform(jax.random.PRNGKey(2), (N2, K2), jnp.float32, -0.05, 0.05)
    b2v = jax.random.uniform(jax.random.PRNGKey(3), (N2,), jnp.float32, -0.05, 0.05)
    ref2 = jnp.dot(x2, w2.T, precision=lax.Precision.HIGHEST) + b2v
    out2 = jax.block_until_ready(
        classifier_forward(x2, w2, b2v, tile_n=128, tile_k=256))
    assert jnp.allclose(out2, ref2, atol=1e-3, rtol=1e-3)

    print("KERNEL_OK")
</pallas_src>

<mosaic_0001>
module attributes {stable_mosaic.version = 11 : i64} {
  func.func @_classifier_kernel(%arg0: i32, %arg1: i32, %arg2: memref<2x1568xf32, #tpu.memory_space<vmem>>, %arg3: memref<512x1568xf32, #tpu.memory_space<vmem>>, %arg4: memref<1x512xf32, #tpu.memory_space<vmem>>, %arg5: memref<2x512xf32, #tpu.memory_space<vmem>>, %arg6: memref<2x512xf32, #tpu.memory_space<vmem>>) attributes {dimension_semantics = [#tpu.dimension_semantics<parallel>, #tpu.dimension_semantics<arbitrary>], iteration_bounds = array<i64: 1, 1>, scalar_prefetch = 0 : i64, scratch_operands = 1 : i64, tpu.core_type = #tpu.core_type<tc>, window_params = [{transform_indices = @transform_0, window_bounds = array<i64: 2, 1568>}, {transform_indices = @transform_1, window_bounds = array<i64: 512, 1568>}, {transform_indices = @transform_2, window_bounds = array<i64: 1, 512>}, {transform_indices = @transform_3, window_bounds = array<i64: 2, 512>}]} {
    %c0_i32 = arith.constant 0 : i32
    %0 = arith.cmpi eq, %arg1, %c0_i32 : i32
    %1 = arith.extui %0 : i1 to i32
    %c0_i32_0 = arith.constant 0 : i32
    %2 = arith.cmpi ne, %1, %c0_i32_0 : i32
    scf.if %2 {
      %cst_10 = arith.constant 0.000000e+00 : f32
      %12 = vector.broadcast %cst_10 : f32 to vector<2x512xf32>
      %c0_11 = arith.constant 0 : index
      %c0_12 = arith.constant 0 : index
      %13 = vector.load %arg6[%c0_11, %c0_12] : memref<2x512xf32, #tpu.memory_space<vmem>>, vector<2x512xf32>
      tpu.vector_store %arg6[%c0_11, %c0_12], %12 {strides = array<i32>} : memref<2x512xf32, #tpu.memory_space<vmem>>, vector<2x512xf32>,
    } else {
    }
    %c0 = arith.constant 0 : index
    %c0_1 = arith.constant 0 : index
    %3 = vector.load %arg6[%c0, %c0_1] : memref<2x512xf32, #tpu.memory_space<vmem>>, vector<2x512xf32>
    %c0_2 = arith.constant 0 : index
    %c0_3 = arith.constant 0 : index
    %4 = vector.load %arg2[%c0_2, %c0_3] : memref<2x1568xf32, #tpu.memory_space<vmem>>, vector<2x1568xf32>
    %c0_4 = arith.constant 0 : index
    %c0_5 = arith.constant 0 : index
    %5 = vector.load %arg3[%c0_4, %c0_5] : memref<512x1568xf32, #tpu.memory_space<vmem>>, vector<512x1568xf32>
    %cst = arith.constant dense<0.000000e+00> : vector<2x512xf32>
    %6 = tpu.matmul %4, %5, %cst {dimension_numbers = #tpu.dot_dimension_numbers<[1], [1], [0], [0], [0, 0, 1, 0], [], []>} : vector<2x1568xf32>, vector<512x1568xf32>, vector<2x512xf32> -> vector<2x512xf32>
    %7 = arith.addf %3, %6 : vector<2x512xf32>
    %c0_6 = arith.constant 0 : index
    %c0_7 = arith.constant 0 : index
    %8 = vector.load %arg6[%c0_6, %c0_7] : memref<2x512xf32, #tpu.memory_space<vmem>>, vector<2x512xf32>
    tpu.vector_store %arg6[%c0_6, %c0_7], %7 {strides = array<i32>} : memref<2x512xf32, #tpu.memory_space<vmem>>, vector<2x512xf32>,
    %c0_i32_8 = arith.constant 0 : i32
    %9 = arith.cmpi eq, %arg1, %c0_i32_8 : i32
    %10 = arith.extui %9 : i1 to i32
    %c0_i32_9 = arith.constant 0 : i32
    %11 = arith.cmpi ne, %10, %c0_i32_9 : i32
    scf.if %11 {
      %c0_10 = arith.constant 0 : index
      %c0_11 = arith.constant 0 : index
      %12 = vector.load %arg6[%c0_10, %c0_11] : memref<2x512xf32, #tpu.memory_space<vmem>>, vector<2x512xf32>
      %c0_12 = arith.constant 0 : index
      %c0_13 = arith.constant 0 : index
      %13 = vector.load %arg4[%c0_12, %c0_13] : memref<1x512xf32, #tpu.memory_space<vmem>>, vector<1x512xf32>
      %14 = vector.broadcast %13 : vector<1x512xf32> to vector<2x512xf32>
      %15 = arith.addf %12, %14 : vector<2x512xf32>
      %c0_14 = arith.constant 0 : index
      %c0_15 = arith.constant 0 : index
      %16 = vector.load %arg5[%c0_14, %c0_15] : memref<2x512xf32, #tpu.memory_space<vmem>>, vector<2x512xf32>
      tpu.vector_store %arg5[%c0_14, %c0_15], %15 {strides = array<i32>} : memref<2x512xf32, #tpu.memory_space<vmem>>, vector<2x512xf32>,
    } else {
    }
    return
  }
  func.func @transform_0(%arg0: i32, %arg1: i32) -> (i32, i32) {
    %c0_i32 = arith.constant 0 : i32
    %c0_i32_0 = arith.constant 0 : i32
    return %c0_i32, %arg1 : i32, i32
  }
  func.func @transform_1(%arg0: i32, %arg1: i32) -> (i32, i32) {
    %c0_i32 = arith.constant 0 : i32
    return %arg0, %arg1 : i32, i32
  }
  func.func @transform_2(%arg0: i32, %arg1: i32) -> (i32, i32) {
    %c0_i32 = arith.constant 0 : i32
    %c0_i32_0 = arith.constant 0 : i32
    return %c0_i32, %arg0 : i32, i32
  }
  func.func @transform_3(%arg0: i32, %arg1: i32) -> (i32, i32) {
    %c0_i32 = arith.constant 0 : i32
    %c0_i32_0 = arith.constant 0 : i32
    return %c0_i32, %arg0 : i32, i32
  }
}

</mosaic_0001>

<bundles_post_ra>
// kernel: tpu_custom_call.1
= control target key start
LH: loop header
LB: loop body
LE: loop exit
PB: predicated region body
PF: predicated region fallthrough
CT: control target
= control target key end

     0   :  { %v3252_v62 = vmov 1983009808   ;;  %s5947_s0 = inlined_call_operand.vmem [shape: f32[2,1568], index: 0, kind: input, shape index: {}]   ;;  %s5948_s1 = inlined_call_operand.vmem [shape: f32[512,1568], index: 1, kind: input, shape index: {}]   ;;  %s5949_s2 = inlined_call_operand.vmem [shape: f32[1,512], index: 2, kind: input, shape index: {}]   ;;  %s5950_s3 = inlined_call_operand.hbm [shape: f32[2,512], index: 3, kind: output, shape index: {}]  }
   0x1   :  { %v26_v0 = vld [vmem:[%s5948_s1 + $0x8] sm:$0xff]  ;;  %v39_v1 = vld [vmem:[%s5948_s1 + $0x70] sm:$0xff]  ;;  %v25_v5 = vld [vmem:[%s5948_s1] sm:$0xff]  ;;  %v863_v63 = vunpack.c.l.s4 %v3252_v62 }
   0x2   :  { %v442_v2 = vld [vmem:[%s5948_s1 + $0xd08] sm:$0xff]  ;;  %v2335_v3 = vpack.c.bf16 %v39_v1, %v26_v0  ;;  %v455_v4 = vld [vmem:[%s5948_s1 + $0xd70] sm:$0xff]  ;;  %v441_v9 = vld [vmem:[%s5948_s1 + $0xd00] sm:$0xff]  ;;  %v865_v0 = vlaneseq }
   0x3   :  { %v38_v6 = vld [vmem:[%s5948_s1 + $0x68] sm:$0xff]  ;;  %v2767_v7 = vpack.c.bf16 %v455_v4, %v442_v2  ;;  %v52_v11 = vld [vmem:[%s5948_s1 + $0xd8] sm:$0xff]  ;;  %v65_v13 = vld [vmem:[%s5948_s1 + $0x140] sm:$0xff] }
   0x4   :  { %v2337_v8 = vpack.c.bf16 %v38_v6, %v25_v5  ;;  %v454_v10 = vld [vmem:[%s5948_s1 + $0xd68] sm:$0xff]  ;;  %2336 = vmatprep.subr.bf16.mxu0 %v2335_v3  ;;  %v468_v14 = vld [vmem:[%s5948_s1 + $0xdd8] sm:$0xff]  ;;  %v481_v15 = vld [vmem:[%s5948_s1 + $0xe40] sm:$0xff]  ;;  %v2339_v16 = vpack.c.bf16 %v65_v13, %v52_v11  ;;  %v864_v5 = vunpack.c.0.s8 %v863_v63  ;;  %v3406_v6 = vshrl.u32 %v865_v0, 7 }
   0x5   :  { %v2769_v12 = vpack.c.bf16 %v454_v10, %v441_v9  ;;  %2768 = vmatprep.subr.bf16.mxu1 %v2767_v7  ;;  %v2771_v17 = vpack.c.bf16 %v481_v15, %v468_v14  ;;  %v51_v18 = vld [vmem:[%s5948_s1 + $0xd0] sm:$0xff]  ;;  %v64_v19 = vld [vmem:[%s5948_s1 + $0x138] sm:$0xff]  ;;  %v78_v22 = vld [vmem:[%s5948_s1 + $0x1a8] sm:$0xff] }
   0x6   :  { %2338 = vmatpush1.bf16.xpose.msra.mxu0 %v2337_v8  ;;  %v467_v20 = vld [vmem:[%s5948_s1 + $0xdd0] sm:$0xff]  ;;  %v480_v21 = vld [vmem:[%s5948_s1 + $0xe38] sm:$0xff]  ;;  %v494_v24 = vld [vmem:[%s5948_s1 + $0xea8] sm:$0xff]  ;;  %v2341_v26 = vpack.c.bf16 %v64_v19, %v51_v18  ;;  %v3433_v15 = vsub.s32 %v864_v5, %v3406_v6 }
   0x7   :  { %2770 = vmatpush1.bf16.xpose.msra.mxu1 %v2769_v12  ;;  %2340 = vmatprep.subr.bf16.mxu0 %v2339_v16  ;;  %v91_v23 = vld [vmem:[%s5948_s1 + $0x210] sm:$0xff]  ;;  %v2773_v27 = vpack.c.bf16 %v480_v21, %v467_v20  ;;  %v77_v30 = vld [vmem:[%s5948_s1 + $0x1a0] sm:$0xff]  ;;  %v90_v31 = vld [vmem:[%s5948_s1 + $0x208] sm:$0xff] }
   0x8   :  { %2772 = vmatprep.subr.bf16.mxu1 %v2771_v17  ;;  %v507_v25 = vld [vmem:[%s5948_s1 + $0xf10] sm:$0xff]  ;;  %v2343_v28 = vpack.c.bf16 %v91_v23, %v78_v22  ;;  %v493_v32 = vld [vmem:[%s5948_s1 + $0xea0] sm:$0xff]  ;;  %v506_v33 = vld [vmem:[%s5948_s1 + $0xf08] sm:$0xff]  ;;  %v2345_v38 = vpack.c.bf16 %v90_v31, %v77_v30 }
   0x9   :  { %v2775_v29 = vpack.c.bf16 %v507_v25, %v494_v24  ;;  %v104_v34 = vld [vmem:[%s5948_s1 + $0x278] sm:$0xff]  ;;  %v117_v35 = vld [vmem:[%s5948_s1 + $0x2e0] sm:$0xff]  ;;  %v2777_v39 = vpack.c.bf16 %v506_v33, %v493_v32  ;;  %v103_v42 = vld [vmem:[%s5948_s1 + $0x270] sm:$0xff] }
   0xa   :  { %v520_v36 = vld [vmem:[%s5948_s1 + $0xf78] sm:$0xff]  ;;  %v533_v37 = vld [vmem:[%s5948_s1 + $0xfe0] sm:$0xff]  ;;  %v2347_v40 = vpack.c.bf16 %v117_v35, %v104_v34  ;;  %v519_v44 = vld [vmem:[%s5948_s1 + $0xf70] sm:$0xff] }
   0xb   :  { %v2779_v41 = vpack.c.bf16 %v533_v37, %v520_v36  ;;  %v116_v43 = vld [vmem:[%s5948_s1 + $0x2d8] sm:$0xff]  ;;  %v130_v46 = vld [vmem:[%s5948_s1 + $0x348] sm:$0xff]  ;;  %v143_v47 = vld [vmem:[%s5948_s1 + $0x3b0] sm:$0xff] }
   0xc   :  { %v532_v45 = vld [vmem:[%s5948_s1 + $0xfd8] sm:$0xff]  ;;  %v546_v48 = vld [vmem:[%s5948_s1 + $0x1048] sm:$0xff]  ;;  %v559_v49 = vld [vmem:[%s5948_s1 + $0x10b0] sm:$0xff]  ;;  %v2349_v50 = vpack.c.bf16 %v116_v43, %v103_v42  ;;  %v2351_v52 = vpack.c.bf16 %v143_v47, %v130_v46 }
   0xd   :  { %v2781_v51 = vpack.c.bf16 %v532_v45, %v519_v44  ;;  %v2783_v53 = vpack.c.bf16 %v559_v49, %v546_v48  ;;  %v129_v54 = vld [vmem:[%s5948_s1 + $0x340] sm:$0xff]  ;;  %v142_v55 = vld [vmem:[%s5948_s1 + $0x3a8] sm:$0xff]  ;;  %v156_v58 = vld [vmem:[%s5948_s1 + $0x418] sm:$0xff] }
   0xe   :  { %2342 = vmatpush1.bf16.xpose.msra.mxu0 %v2341_v26  ;;  %v545_v56 = vld [vmem:[%s5948_s1 + $0x1040] sm:$0xff]  ;;  %v558_v57 = vld [vmem:[%s5948_s1 + $0x10a8] sm:$0xff]  ;;  %v572_v60 = vld [vmem:[%s5948_s1 + $0x1118] sm:$0xff]  ;;  %v2353_v1 = vpack.c.bf16 %v142_v55, %v129_v54 }
   0xf   :  { %2774 = vmatpush1.bf16.xpose.msra.mxu1 %v2773_v27  ;;  %2344 = vmatprep.subr.bf16.mxu0 %v2343_v28  ;;  %v169_v59 = vld [vmem:[%s5948_s1 + $0x480] sm:$0xff]  ;;  %v2785_v2 = vpack.c.bf16 %v558_v57, %v545_v56  ;;  %v155_v7 = vld [vmem:[%s5948_s1 + $0x410] sm:$0xff]  ;;  %v168_v8 = vld [vmem:[%s5948_s1 + $0x478] sm:$0xff] }
  0x10   :  { %2776 = vmatprep.subr.bf16.mxu1 %v2775_v29  ;;  %v585_v61 = vld [vmem:[%s5948_s1 + $0x1180] sm:$0xff]  ;;  %v2355_v3 = vpack.c.bf16 %v169_v59, %v156_v58  ;;  %v571_v9 = vld [vmem:[%s5948_s1 + $0x1110] sm:$0xff]  ;;  %v584_v10 = vld [vmem:[%s5948_s1 + $0x1178] sm:$0xff]  ;;  %v2357_v16 = vpack.c.bf16 %v168_v8, %v155_v7 }
  0x11   :  { %v2787_v4 = vpack.c.bf16 %v585_v61, %v572_v60  ;;  %v182_v11 = vld [vmem:[%s5948_s1 + $0x4e8] sm:$0xff]  ;;  %v195_v12 = vld [vmem:[%s5948_s1 + $0x550] sm:$0xff]  ;;  %v2789_v17 = vpack.c.bf16 %v584_v10, %v571_v9  ;;  %v3438_v20 = vld [vmem:[%s5947_s0] sm:$0xff] }
  0x12   :  { %v598_v13 = vld [vmem:[%s5948_s1 + $0x11e8] sm:$0xff]  ;;  %v611_v14 = vld [vmem:[%s5948_s1 + $0x1250] sm:$0xff]  ;;  %v2359_v18 = vpack.c.bf16 %v195_v12, %v182_v11  ;;  %v3442_v21 = vrot.slane %v3438_v20, %v3433_v15  ;;  %v181_v22 = vld [vmem:[%s5948_s1 + $0x4e0] sm:$0xff] }
  0x13   :  { %v2791_v19 = vpack.c.bf16 %v611_v14, %v598_v13  ;;  %v194_v23 = vld [vmem:[%s5948_s1 + $0x548] sm:$0xff]  ;;  %v597_v24 = vld [vmem:[%s5948_s1 + $0x11e0] sm:$0xff]  ;;  %v208_v27 = vld [vmem:[%s5948_s1 + $0x5b8] sm:$0xff] }
  0x14   :  { %v876_v25 = vcombine.high %v3442_v21, %v3442_v21  ;;  %v610_v26 = vld [vmem:[%s5948_s1 + $0x1248] sm:$0xff]  ;;  %v221_v28 = vld [vmem:[%s5948_s1 + $0x620] sm:$0xff]  ;;  %v624_v29 = vld [vmem:[%s5948_s1 + $0x12b8] sm:$0xff]  ;;  %v2361_v31 = vpack.c.bf16 %v194_v23, %v181_v22 }
  0x15   :  { %v637_v30 = vld [vmem:[%s5948_s1 + $0x1320] sm:$0xff]  ;;  %v2793_v32 = vpack.c.bf16 %v610_v26, %v597_v24  ;;  %v2363_v33 = vpack.c.bf16 %v221_v28, %v208_v27  ;;  %v207_v35 = vld [vmem:[%s5948_s1 + $0x5b0] sm:$0xff]  ;;  %v220_v36 = vld [vmem:[%s5948_s1 + $0x618] sm:$0xff] }
  0x16   :  { %2346 = vmatpush1.bf16.xpose.msra.mxu0 %v2345_v38  ;;  %1190 = vmatprep.mubr.f32.mxu0 %v876_v25  ;;  %v2795_v34 = vpack.c.bf16 %v637_v30, %v624_v29  ;;  %v623_v37 = vld [vmem:[%s5948_s1 + $0x12b0] sm:$0xff]  ;;  %v636_v38 = vld [vmem:[%s5948_s1 + $0x1318] sm:$0xff]  ;;  %v2365_v43 = vpack.c.bf16 %v220_v36, %v207_v35  ;;  %v233_v47 = vld [vmem:[%s5948_s1 + $0x680] sm:$0xff] }
  0x17   :  { %2778 = vmatpush1.bf16.xpose.msra.mxu1 %v2777_v39  ;;  %2348 = vmatprep.subr.bf16.mxu0 %v2347_v40  ;;  %v234_v39 = vld [vmem:[%s5948_s1 + $0x688] sm:$0xff]  ;;  %v247_v40 = vld [vmem:[%s5948_s1 + $0x6f0] sm:$0xff]  ;;  %v2797_v44 = vpack.c.bf16 %v636_v38, %v623_v37  ;;  %v649_v49 = vld [vmem:[%s5948_s1 + $0x1380] sm:$0xff] }
  0x18   :  { %2780 = vmatprep.subr.bf16.mxu1 %v2779_v41  ;;  %1687 = vmatprep.mubr.f32.mxu1 %v876_v25  ;;  %v650_v41 = vld [vmem:[%s5948_s1 + $0x1388] sm:$0xff]  ;;  %v663_v42 = vld [vmem:[%s5948_s1 + $0x13f0] sm:$0xff]  ;;  %v2367_v45 = vpack.c.bf16 %v247_v40, %v234_v39  ;;  %v689_v54 = vld [vmem:[%s5948_s1 + $0x14c0] sm:$0xff] }
  0x19   :  { %v2799_v46 = vpack.c.bf16 %v663_v42, %v650_v41  ;;  %v246_v48 = vld [vmem:[%s5948_s1 + $0x6e8] sm:$0xff] }
  0x1a   :  { %v2369_v55 = vpack.c.bf16 %v246_v48, %v233_v47 }
  0x1e   :  { %2350 = vmatpush1.bf16.xpose.msra.mxu0 %v2349_v50  ;;  %v662_v50 = vld [vmem:[%s5948_s1 + $0x13e8] sm:$0xff] }
  0x1f   :  { %2782 = vmatpush1.bf16.xpose.msra.mxu1 %v2781_v51  ;;  %2352 = vmatprep.subr.bf16.mxu0 %v2351_v52  ;;  %v260_v51 = vld [vmem:[%s5948_s1 + $0x758] sm:$0xff]  ;;  %v273_v52 = vld [vmem:[%s5948_s1 + $0x7c0] sm:$0xff]  ;;  %v2801_v56 = vpack.c.bf16 %v662_v50, %v649_v49 }
  0x20   :  { %2784 = vmatprep.subr.bf16.mxu1 %v2783_v53  ;;  %v676_v53 = vld [vmem:[%s5948_s1 + $0x1458] sm:$0xff]  ;;  %v2371_v57 = vpack.c.bf16 %v273_v52, %v260_v51 }
  0x21   :  { %v2803_v58 = vpack.c.bf16 %v689_v54, %v676_v53 }
  0x26   :  { %2354 = vmatpush1.bf16.xpose.msra.mxu0 %v2353_v1 }
  0x27   :  { %2786 = vmatpush1.bf16.xpose.msra.mxu1 %v2785_v2  ;;  %2356 = vmatprep.subr.bf16.mxu0 %v2355_v3 }
  0x28   :  { %2788 = vmatprep.subr.bf16.mxu1 %v2787_v4 }
  0x2e   :  { %2358 = vmatpush1.bf16.xpose.msra.mxu0 %v2357_v16 }
  0x2f   :  { %2790 = vmatpush1.bf16.xpose.msra.mxu1 %v2789_v17  ;;  %2360 = vmatprep.subr.bf16.mxu0 %v2359_v18 }
  0x30   :  { %2792 = vmatprep.subr.bf16.mxu1 %v2791_v19 }
  0x36   :  { %2362 = vmatpush1.bf16.xpose.msra.mxu0 %v2361_v31 }
  0x37   :  { %2794 = vmatpush1.bf16.xpose.msra.mxu1 %v2793_v32  ;;  %2364 = vmatprep.subr.bf16.mxu0 %v2363_v33 }
  0x38   :  { %2796 = vmatprep.subr.bf16.mxu1 %v2795_v34 }
  0x3e   :  { %2366 = vmatpush1.bf16.xpose.msra.mxu0 %v2365_v43 }
  0x3f   :  { %2798 = vmatpush1.bf16.xpose.msra.mxu1 %v2797_v44  ;;  %2368 = vmatprep.subr.bf16.mxu0 %v2367_v45 }
  0x40   :  { %2800 = vmatprep.subr.bf16.mxu1 %v2799_v46 }
  0x41   :  { %8 = vsyncpa [#allocation4], 0  ;;  %v259_v59 = vld [vmem:[%s5948_s1 + $0x750] sm:$0xff]  ;;  %v272_v60 = vld [vmem:[%s5948_s1 + $0x7b8] sm:$0xff]  ;;  %vm931_vm0 = vcmask 261120  }
  0x42   :  { %v675_v61 = vld [vmem:[%s5948_s1 + $0x1450] sm:$0xff]  ;;  %v688_v62 = vld [vmem:[%s5948_s1 + $0x14b8] sm:$0xff]  ;;  %v286_v63 = vld [vmem:[%s5948_s1 + $0x828] sm:$0xff]  ;;  %v2373_v3 = vpack.c.bf16 %v272_v60, %v259_v59 }
  0x43   :  { %v299_v0 = vld [vmem:[%s5948_s1 + $0x890] sm:$0xff]  ;;  %v702_v1 = vld [vmem:[%s5948_s1 + $0x1528] sm:$0xff]  ;;  %v2805_v4 = vpack.c.bf16 %v688_v62, %v675_v61  ;;  %v285_v8 = vld [vmem:[%s5948_s1 + $0x820] sm:$0xff] }
  0x44   :  { %v715_v2 = vld [vmem:[%s5948_s1 + $0x1590] sm:$0xff]  ;;  %v2375_v5 = vpack.c.bf16 %v299_v0, %v286_v63  ;;  %v298_v9 = vld [vmem:[%s5948_s1 + $0x888] sm:$0xff]  ;;  %v701_v10 = vld [vmem:[%s5948_s1 + $0x1520] sm:$0xff] }
  0x45   :  { %v2807_v7 = vpack.c.bf16 %v715_v2, %v702_v1  ;;  %v714_v11 = vld [vmem:[%s5948_s1 + $0x1588] sm:$0xff]  ;;  %v312_v12 = vld [vmem:[%s5948_s1 + $0x8f8] sm:$0xff]  ;;  %v325_v13 = vld [vmem:[%s5948_s1 + $0x960] sm:$0xff]  ;;  %v2377_v17 = vpack.c.bf16 %v298_v9, %v285_v8 }
  0x46   :  { %2370 = vmatpush1.bf16.xpose.msra.mxu0 %v2369_v55  ;;  %v728_v14 = vld [vmem:[%s5948_s1 + $0x15f8] sm:$0xff]  ;;  %v741_v16 = vld [vmem:[%s5948_s1 + $0x1660] sm:$0xff]  ;;  %v2809_v18 = vpack.c.bf16 %v714_v11, %v701_v10  ;;  %v2379_v19 = vpack.c.bf16 %v325_v13, %v312_v12  ;;  %v311_v23 = vld [vmem:[%s5948_s1 + $0x8f0] sm:$0xff] }
  0x47   :  { %2802 = vmatpush1.bf16.xpose.msra.mxu1 %v2801_v56  ;;  %2372 = vmatprep.subr.bf16.mxu0 %v2371_v57  ;;  %v2811_v22 = vpack.c.bf16 %v741_v16, %v728_v14  ;;  %v324_v24 = vld [vmem:[%s5948_s1 + $0x958] sm:$0xff]  ;;  %v727_v25 = vld [vmem:[%s5948_s1 + $0x15f0] sm:$0xff]  ;;  %v338_v27 = vld [vmem:[%s5948_s1 + $0x9c8] sm:$0xff] }
  0x48   :  { %2804 = vmatprep.subr.bf16.mxu1 %v2803_v58  ;;  %v740_v26 = vld [vmem:[%s5948_s1 + $0x1658] sm:$0xff]  ;;  %v351_v28 = vld [vmem:[%s5948_s1 + $0xa30] sm:$0xff]  ;;  %v754_v29 = vld [vmem:[%s5948_s1 + $0x16c8] sm:$0xff]  ;;  %v2381_v31 = vpack.c.bf16 %v324_v24, %v311_v23 }
  0x49   :  { %v767_v30 = vld [vmem:[%s5948_s1 + $0x1730] sm:$0xff]  ;;  %v2813_v32 = vpack.c.bf16 %v740_v26, %v727_v25  ;;  %v2383_v33 = vpack.c.bf16 %v351_v28, %v338_v27  ;;  %v337_v35 = vld [vmem:[%s5948_s1 + $0x9c0] sm:$0xff]  ;;  %v350_v36 = vld [vmem:[%s5948_s1 + $0xa28] sm:$0xff] }
  0x4a   :  { %v2815_v34 = vpack.c.bf16 %v767_v30, %v754_v29  ;;  %v753_v37 = vld [vmem:[%s5948_s1 + $0x16c0] sm:$0xff]  ;;  %v766_v38 = vld [vmem:[%s5948_s1 + $0x1728] sm:$0xff]  ;;  %v364_v39 = vld [vmem:[%s5948_s1 + $0xa98] sm:$0xff]  ;;  %v2385_v43 = vpack.c.bf16 %v350_v36, %v337_v35 }
  0x4b   :  { %v377_v40 = vld [vmem:[%s5948_s1 + $0xb00] sm:$0xff]  ;;  %v780_v41 = vld [vmem:[%s5948_s1 + $0x1798] sm:$0xff]  ;;  %v2817_v44 = vpack.c.bf16 %v766_v38, %v753_v37  ;;  %v363_v47 = vld [vmem:[%s5948_s1 + $0xa90] sm:$0xff] }
  0x4c   :  { %v793_v42 = vld [vmem:[%s5948_s1 + $0x1800] sm:$0xff]  ;;  %v2387_v45 = vpack.c.bf16 %v377_v40, %v364_v39  ;;  %v376_v48 = vld [vmem:[%s5948_s1 + $0xaf8] sm:$0xff]  ;;  %v779_v49 = vld [vmem:[%s5948_s1 + $0x1790] sm:$0xff] }
  0x4d   :  { %v2819_v46 = vpack.c.bf16 %v793_v42, %v780_v41  ;;  %v792_v50 = vld [vmem:[%s5948_s1 + $0x17f8] sm:$0xff]  ;;  %v390_v51 = vld [vmem:[%s5948_s1 + $0xb68] sm:$0xff]  ;;  %v403_v52 = vld [vmem:[%s5948_s1 + $0xbd0] sm:$0xff]  ;;  %v2389_v55 = vpack.c.bf16 %v376_v48, %v363_v47 }
  0x4e   :  { %2374 = vmatpush1.bf16.xpose.msra.mxu0 %v2373_v3  ;;  %v806_v53 = vld [vmem:[%s5948_s1 + $0x1868] sm:$0xff]  ;;  %v819_v54 = vld [vmem:[%s5948_s1 + $0x18d0] sm:$0xff]  ;;  %v2821_v56 = vpack.c.bf16 %v792_v50, %v779_v49  ;;  %v2391_v57 = vpack.c.bf16 %v403_v52, %v390_v51  ;;  %v389_v59 = vld [vmem:[%s5948_s1 + $0xb60] sm:$0xff] }
  0x4f   :  { %2806 = vmatpush1.bf16.xpose.msra.mxu1 %v2805_v4  ;;  %2376 = vmatprep.subr.bf16.mxu0 %v2375_v5  ;;  %v2823_v58 = vpack.c.bf16 %v819_v54, %v806_v53  ;;  %v402_v60 = vld [vmem:[%s5948_s1 + $0xbc8] sm:$0xff]  ;;  %v805_v61 = vld [vmem:[%s5948_s1 + $0x1860] sm:$0xff]  ;;  %v416_v63 = vld [vmem:[%s5948_s1 + $0xc38] sm:$0xff] }
  0x50   :  { %2808 = vmatprep.subr.bf16.mxu1 %v2807_v7  ;;  %v818_v62 = vld [vmem:[%s5948_s1 + $0x18c8] sm:$0xff]  ;;  %v429_v0 = vld [vmem:[%s5948_s1 + $0xca0] sm:$0xff]  ;;  %v832_v1 = vld [vmem:[%s5948_s1 + $0x1938] sm:$0xff]  ;;  %v2393_v3 = vpack.c.bf16 %v402_v60, %v389_v59 }
  0x51   :  { %v845_v2 = vld [vmem:[%s5948_s1 + $0x19a0] sm:$0xff]  ;;  %v2825_v4 = vpack.c.bf16 %v818_v62, %v805_v61  ;;  %v2395_v5 = vpack.c.bf16 %v429_v0, %v416_v63  ;;  %v415_v8 = vld [vmem:[%s5948_s1 + $0xc30] sm:$0xff]  ;;  %v428_v9 = vld [vmem:[%s5948_s1 + $0xc98] sm:$0xff] }
  0x52   :  { %v2827_v7 = vpack.c.bf16 %v845_v2, %v832_v1  ;;  %v831_v10 = vld [vmem:[%s5948_s1 + $0x1930] sm:$0xff]  ;;  %v844_v11 = vld [vmem:[%s5948_s1 + $0x1998] sm:$0xff]  ;;  %v41_v13 = vld [vmem:[%s5948_s1 + $0x80] sm:$0xff] }
  0x53   :  { %v28_v12 = vld [vmem:[%s5948_s1 + $0x18] sm:$0xff]  ;;  %v457_v16 = vld [vmem:[%s5948_s1 + $0xd80] sm:$0xff]  ;;  %v27_v24 = vld [vmem:[%s5948_s1 + $0x10] sm:$0xff] }
  0x54   :  { %v444_v14 = vld [vmem:[%s5948_s1 + $0xd18] sm:$0xff]  ;;  %v443_v26 = vld [vmem:[%s5948_s1 + $0xd10] sm:$0xff]  ;;  %v54_v27 = vld [vmem:[%s5948_s1 + $0xe8] sm:$0xff] }
  0x55   :  { %v2831_v23 = vpack.c.bf16 %v457_v16, %v444_v14  ;;  %v40_v25 = vld [vmem:[%s5948_s1 + $0x78] sm:$0xff]  ;;  %v67_v28 = vld [vmem:[%s5948_s1 + $0x150] sm:$0xff]  ;;  %v470_v30 = vld [vmem:[%s5948_s1 + $0xde8] sm:$0xff] }
  0x56   :  { %2378 = vmatpush1.bf16.xpose.msra.mxu0 %v2377_v17  ;;  %v2397_v17 = vpack.c.bf16 %v428_v9, %v415_v8  ;;  %v53_v37 = vld [vmem:[%s5948_s1 + $0xe0] sm:$0xff]  ;;  %v66_v38 = vld [vmem:[%s5948_s1 + $0x148] sm:$0xff]  ;;  %v496_v42 = vld [vmem:[%s5948_s1 + $0xeb8] sm:$0xff] }
  0x57   :  { %2810 = vmatpush1.bf16.xpose.msra.mxu1 %v2809_v18  ;;  %2380 = vmatprep.subr.bf16.mxu0 %v2379_v19  ;;  %v2829_v18 = vpack.c.bf16 %v844_v11, %v831_v10  ;;  %v2399_v19 = vpack.c.bf16 %v41_v13, %v28_v12  ;;  %v469_v39 = vld [vmem:[%s5948_s1 + $0xde0] sm:$0xff]  ;;  %v482_v40 = vld [vmem:[%s5948_s1 + $0xe48] sm:$0xff]  ;;  %v79_v48 = vld [vmem:[%s5948_s1 + $0x1b0] sm:$0xff] }
  0x58   :  { %2812 = vmatprep.subr.bf16.mxu1 %v2811_v22  ;;  %v861_v22 = vcombine.high %v3438_v20, %v3438_v20  ;;  %v456_v20 = vld [vmem:[%s5948_s1 + $0xd78] sm:$0xff]  ;;  %v93_v41 = vld [vmem:[%s5948_s1 + $0x220] sm:$0xff]  ;;  %v495_v50 = vld [vmem:[%s5948_s1 + $0xeb0] sm:$0xff] }
  0x59   :  { %v92_v49 = vld [vmem:[%s5948_s1 + $0x218] sm:$0xff]  ;;  %v106_v52 = vld [vmem:[%s5948_s1 + $0x288] sm:$0xff]  ;;  %v119_v53 = vld [vmem:[%s5948_s1 + $0x2f0] sm:$0xff] }
  0x5a   :  { %v3707_v29 = vrot.slane %v861_v22, %v3433_v15  ;;  %v508_v51 = vld [vmem:[%s5948_s1 + $0xf18] sm:$0xff]  ;;  %v522_v54 = vld [vmem:[%s5948_s1 + $0xf88] sm:$0xff]  ;;  %v105_v60 = vld [vmem:[%s5948_s1 + $0x280] sm:$0xff] }
  0x5b   :  { %v118_v61 = vld [vmem:[%s5948_s1 + $0x2e8] sm:$0xff]  ;;  %v521_v62 = vld [vmem:[%s5948_s1 + $0xf80] sm:$0xff]  ;;  %v132_v0 = vld [vmem:[%s5948_s1 + $0x358] sm:$0xff] }
  0x5c   :  { %v877_v36 = vcombine.high %v3707_v29, %v3707_v29  ;;  %v534_v63 = vld [vmem:[%s5948_s1 + $0xfe8] sm:$0xff]  ;;  %v145_v1 = vld [vmem:[%s5948_s1 + $0x3c0] sm:$0xff]  ;;  %v548_v2 = vld [vmem:[%s5948_s1 + $0x1058] sm:$0xff] }
  0x5d   :  { %v131_v9 = vld [vmem:[%s5948_s1 + $0x350] sm:$0xff]  ;;  %v144_v10 = vld [vmem:[%s5948_s1 + $0x3b8] sm:$0xff]  ;;  %v158_v13 = vld [vmem:[%s5948_s1 + $0x428] sm:$0xff] }
  0x5e   :  { %2382 = vmatpush1.bf16.xpose.msra.mxu0 %v2381_v31  ;;  %v483_v31 = vld [vmem:[%s5948_s1 + $0xe50] sm:$0xff]  ;;  %v560_v12 = vld [vmem:[%s5948_s1 + $0x10b8] sm:$0xff]  ;;  %v574_v16 = vld [vmem:[%s5948_s1 + $0x1128] sm:$0xff] }
  0x5f   :  { %2814 = vmatpush1.bf16.xpose.msra.mxu1 %v2813_v32  ;;  %2384 = vmatprep.subr.bf16.mxu0 %v2383_v33  ;;  %v2401_v32 = vpack.c.bf16 %v40_v25, %v27_v24  ;;  %v2833_v33 = vpack.c.bf16 %v456_v20, %v443_v26  ;;  %v2835_v35 = vpack.c.bf16 %v483_v31, %v470_v30  ;;  %v547_v11 = vld [vmem:[%s5948_s1 + $0x1050] sm:$0xff]  ;;  %v157_v24 = vld [vmem:[%s5948_s1 + $0x420] sm:$0xff]  ;;  %v170_v25 = vld [vmem:[%s5948_s1 + $0x488] sm:$0xff] }
  0x60   :  { %2816 = vmatprep.subr.bf16.mxu1 %v2815_v34  ;;  %v2403_v34 = vpack.c.bf16 %v67_v28, %v54_v27  ;;  %v171_v14 = vld [vmem:[%s5948_s1 + $0x490] sm:$0xff]  ;;  %v573_v26 = vld [vmem:[%s5948_s1 + $0x1120] sm:$0xff]  ;;  %v586_v20 = vld [vmem:[%s5948_s1 + $0x1188] sm:$0xff] }
  0x61   :  { %v2419_v22 = vpack.c.bf16 %v171_v14, %v158_v13  ;;  %v184_v27 = vld [vmem:[%s5948_s1 + $0x4f8] sm:$0xff]  ;;  %v197_v28 = vld [vmem:[%s5948_s1 + $0x560] sm:$0xff]  ;;  %vm5661_vm1 = vmpackc.low %vm931_vm0, %vm931_vm0 }
  0x62   :  { %v600_v30 = vld [vmem:[%s5948_s1 + $0x11f8] sm:$0xff]  ;;  %v613_v31 = vld [vmem:[%s5948_s1 + $0x1260] sm:$0xff] }
  0x63   :  { %v301_v13 = vld [vmem:[%s5948_s1 + $0x8a0] sm:$0xff]  ;;  %v704_v14 = vld [vmem:[%s5948_s1 + $0x1538] sm:$0xff] }
  0x66   :  { %2386 = vmatpush1.bf16.xpose.msra.mxu0 %v2385_v43  ;;  %v509_v43 = vld [vmem:[%s5948_s1 + $0xf20] sm:$0xff] }
  0x67   :  { %2818 = vmatpush1.bf16.xpose.msra.mxu1 %v2817_v44  ;;  %2388 = vmatprep.subr.bf16.mxu0 %v2387_v45  ;;  %v2405_v44 = vpack.c.bf16 %v66_v38, %v53_v37  ;;  %v2837_v45 = vpack.c.bf16 %v482_v40, %v469_v39  ;;  %v2839_v47 = vpack.c.bf16 %v509_v43, %v496_v42  ;;  %v196_v37 = vld [vmem:[%s5948_s1 + $0x558] sm:$0xff]  ;;  %v599_v38 = vld [vmem:[%s5948_s1 + $0x11f0] sm:$0xff]  ;;  %v210_v40 = vld [vmem:[%s5948_s1 + $0x5c8] sm:$0xff] }
  0x68   :  { %2820 = vmatprep.subr.bf16.mxu1 %v2819_v46  ;;  %v612_v39 = vld [vmem:[%s5948_s1 + $0x1258] sm:$0xff]  ;;  %v639_v42 = vld [vmem:[%s5948_s1 + $0x1330] sm:$0xff] }
  0x6e   :  { %2390 = vmatpush1.bf16.xpose.msra.mxu0 %v2389_v55  ;;  %v535_v55 = vld [vmem:[%s5948_s1 + $0xff0] sm:$0xff] }
  0x6f   :  { %2822 = vmatpush1.bf16.xpose.msra.mxu1 %v2821_v56  ;;  %2392 = vmatprep.subr.bf16.mxu0 %v2391_v57  ;;  %v2409_v56 = vpack.c.bf16 %v92_v49, %v79_v48  ;;  %v2841_v57 = vpack.c.bf16 %v508_v51, %v495_v50  ;;  %v2843_v59 = vpack.c.bf16 %v535_v55, %v522_v54  ;;  %v222_v48 = vld [vmem:[%s5948_s1 + $0x628] sm:$0xff]  ;;  %v625_v49 = vld [vmem:[%s5948_s1 + $0x12c0] sm:$0xff]  ;;  %v236_v51 = vld [vmem:[%s5948_s1 + $0x698] sm:$0xff] }
  0x70   :  { %2824 = vmatprep.subr.bf16.mxu1 %v2823_v58  ;;  %v2411_v58 = vpack.c.bf16 %v119_v53, %v106_v52  ;;  %v638_v50 = vld [vmem:[%s5948_s1 + $0x1328] sm:$0xff]  ;;  %v249_v52 = vld [vmem:[%s5948_s1 + $0x700] sm:$0xff]  ;;  %v652_v53 = vld [vmem:[%s5948_s1 + $0x1398] sm:$0xff] }
  0x71   :  { %v665_v54 = vld [vmem:[%s5948_s1 + $0x1400] sm:$0xff] }
  0x76   :  { %2394 = vmatpush1.bf16.xpose.msra.mxu0 %v2393_v3  ;;  %v561_v3 = vld [vmem:[%s5948_s1 + $0x10c0] sm:$0xff] }
  0x77   :  { %2826 = vmatpush1.bf16.xpose.msra.mxu1 %v2825_v4  ;;  %2396 = vmatprep.subr.bf16.mxu0 %v2395_v5  ;;  %v2413_v4 = vpack.c.bf16 %v118_v61, %v105_v60  ;;  %v2845_v5 = vpack.c.bf16 %v534_v63, %v521_v62  ;;  %v2847_v8 = vpack.c.bf16 %v561_v3, %v548_v2  ;;  %v248_v60 = vld [vmem:[%s5948_s1 + $0x6f8] sm:$0xff]  ;;  %v651_v61 = vld [vmem:[%s5948_s1 + $0x1390] sm:$0xff]  ;;  %v262_v63 = vld [vmem:[%s5948_s1 + $0x768] sm:$0xff] }
  0x78   :  { %2828 = vmatprep.subr.bf16.mxu1 %v2827_v7  ;;  %v2415_v7 = vpack.c.bf16 %v145_v1, %v132_v0  ;;  %v664_v62 = vld [vmem:[%s5948_s1 + $0x13f8] sm:$0xff]  ;;  %v275_v0 = vld [vmem:[%s5948_s1 + $0x7d0] sm:$0xff]  ;;  %v678_v1 = vld [vmem:[%s5948_s1 + $0x1468] sm:$0xff] }
  0x79   :  { %v691_v2 = vld [vmem:[%s5948_s1 + $0x14d0] sm:$0xff] }
  0x7e   :  { %2398 = vmatpush1.bf16.xpose.msra.mxu0 %v2397_v17  ;;  %v587_v17 = vld [vmem:[%s5948_s1 + $0x1190] sm:$0xff] }
  0x7f   :  { %2830 = vmatpush1.bf16.xpose.msra.mxu1 %v2829_v18  ;;  %2400 = vmatprep.subr.bf16.mxu0 %v2399_v19  ;;  %v2417_v18 = vpack.c.bf16 %v144_v10, %v131_v9  ;;  %v2849_v19 = vpack.c.bf16 %v560_v12, %v547_v11  ;;  %v274_v9 = vld [vmem:[%s5948_s1 + $0x7c8] sm:$0xff]  ;;  %v677_v10 = vld [vmem:[%s5948_s1 + $0x1460] sm:$0xff]  ;;  %v288_v12 = vld [vmem:[%s5948_s1 + $0x838] sm:$0xff] }
  0x80   :  { %2832 = vmatprep.subr.bf16.mxu1 %v2831_v23  ;;  %v2851_v23 = vpack.c.bf16 %v587_v17, %v574_v16  ;;  %v690_v11 = vld [vmem:[%s5948_s1 + $0x14c8] sm:$0xff]  ;;  %v717_v16 = vld [vmem:[%s5948_s1 + $0x15a0] sm:$0xff] }
  0x85   :  { %1191 = vmatmul.mubr.f32.vlgmr.msra.gmra.mrb[0].mxu0 %v3442_v21 }
  0x86   :  { %2402 = vmatpush1.bf16.xpose.msra.mxu0 %v2401_v32  ;;  %1688 = vmatmul.mubr.f32.vlgmr.msra.gmra.mrb[0].mxu1 %v3442_v21  ;;  %v80_v21 = vld [vmem:[%s5948_s1 + $0x1b8] sm:$0xff]  ;;  %v2421_v32 = vpack.c.bf16 %v170_v25, %v157_v24  ;;  %v703_v25 = vld [vmem:[%s5948_s1 + $0x1530] sm:$0xff] }
  0x87   :  { %2834 = vmatpush1.bf16.xpose.msra.mxu1 %v2833_v33  ;;  %2404 = vmatprep.subr.bf16.mxu0 %v2403_v34  ;;  %v2407_v46 = vpack.c.bf16 %v93_v41, %v80_v21  ;;  %v2853_v33 = vpack.c.bf16 %v586_v20, %v573_v26  ;;  %v2423_v34 = vpack.c.bf16 %v197_v28, %v184_v27  ;;  %v223_v21 = vld [vmem:[%s5948_s1 + $0x630] sm:$0xff]  ;;  %v626_v41 = vld [vmem:[%s5948_s1 + $0x12c8] sm:$0xff]  ;;  %v300_v24 = vld [vmem:[%s5948_s1 + $0x898] sm:$0xff] }
  0x88   :  { %2836 = vmatprep.subr.bf16.mxu1 %v2835_v35  ;;  %1261 = vmatprep.mubr.f32.mxu0 %v877_v36  ;;  %v2855_v35 = vpack.c.bf16 %v613_v31, %v600_v30  ;;  %v716_v26 = vld [vmem:[%s5948_s1 + $0x1598] sm:$0xff]  ;;  %v314_v20 = vld [vmem:[%s5948_s1 + $0x908] sm:$0xff]  ;;  %v327_v27 = vld [vmem:[%s5948_s1 + $0x970] sm:$0xff] }
  0x89   :  { %1758 = vmatprep.mubr.f32.mxu1 %v877_v36  ;;  %v183_v36 = vld [vmem:[%s5948_s1 + $0x4f0] sm:$0xff]  ;;  %v730_v28 = vld [vmem:[%s5948_s1 + $0x1608] sm:$0xff] }
  0x8a   :  { %v2425_v43 = vpack.c.bf16 %v196_v37, %v183_v36  ;;  %v743_v30 = vld [vmem:[%s5948_s1 + $0x1670] sm:$0xff]  ;;  %v326_v36 = vld [vmem:[%s5948_s1 + $0x968] sm:$0xff]  ;;  %v729_v37 = vld [vmem:[%s5948_s1 + $0x1600] sm:$0xff] }
  0x8e   :  { %2406 = vmatpush1.bf16.xpose.msra.mxu0 %v2405_v44  ;;  %v2857_v44 = vpack.c.bf16 %v612_v39, %v599_v38  ;;  %v742_v38 = vld [vmem:[%s5948_s1 + $0x1668] sm:$0xff]  ;;  %v340_v39 = vld [vmem:[%s5948_s1 + $0x9d8] sm:$0xff] }
  0x8f   :  { %2838 = vmatpush1.bf16.xpose.msra.mxu1 %v2837_v45  ;;  %2408 = vmatprep.subr.bf16.mxu0 %v2407_v46  ;;  %v2427_v45 = vpack.c.bf16 %v223_v21, %v210_v40  ;;  %v2859_v46 = vpack.c.bf16 %v639_v42, %v626_v41  ;;  %v353_v40 = vld [vmem:[%s5948_s1 + $0xa40] sm:$0xff]  ;;  %v756_v21 = vld [vmem:[%s5948_s1 + $0x16d8] sm:$0xff] }
  0x90   :  { %2840 = vmatprep.subr.bf16.mxu1 %v2839_v47  ;;  %v209_v47 = vld [vmem:[%s5948_s1 + $0x5c0] sm:$0xff] }
  0x91   :  { %v2429_v55 = vpack.c.bf16 %v222_v48, %v209_v47  ;;  %v769_v41 = vld [vmem:[%s5948_s1 + $0x1740] sm:$0xff]  ;;  %v352_v47 = vld [vmem:[%s5948_s1 + $0xa38] sm:$0xff]  ;;  %v755_v48 = vld [vmem:[%s5948_s1 + $0x16d0] sm:$0xff] }
  0x96   :  { %2410 = vmatpush1.bf16.xpose.msra.mxu0 %v2409_v56  ;;  %v2861_v56 = vpack.c.bf16 %v638_v50, %v625_v49  ;;  %v768_v49 = vld [vmem:[%s5948_s1 + $0x1738] sm:$0xff]  ;;  %v366_v50 = vld [vmem:[%s5948_s1 + $0xaa8] sm:$0xff] }
  0x97   :  { %2842 = vmatpush1.bf16.xpose.msra.mxu1 %v2841_v57  ;;  %2412 = vmatprep.subr.bf16.mxu0 %v2411_v58  ;;  %v2431_v57 = vpack.c.bf16 %v249_v52, %v236_v51  ;;  %v2863_v58 = vpack.c.bf16 %v665_v54, %v652_v53  ;;  %v379_v51 = vld [vmem:[%s5948_s1 + $0xb10] sm:$0xff]  ;;  %v782_v52 = vld [vmem:[%s5948_s1 + $0x17a8] sm:$0xff] }
  0x98   :  { %2844 = vmatprep.subr.bf16.mxu1 %v2843_v59  ;;  %v235_v59 = vld [vmem:[%s5948_s1 + $0x690] sm:$0xff] }
  0x99   :  { %v2433_v3 = vpack.c.bf16 %v248_v60, %v235_v59  ;;  %v795_v53 = vld [vmem:[%s5948_s1 + $0x1810] sm:$0xff]  ;;  %v378_v59 = vld [vmem:[%s5948_s1 + $0xb08] sm:$0xff]  ;;  %v781_v60 = vld [vmem:[%s5948_s1 + $0x17a0] sm:$0xff] }
  0x9e   :  { %2414 = vmatpush1.bf16.xpose.msra.mxu0 %v2413_v4  ;;  %v2865_v4 = vpack.c.bf16 %v664_v62, %v651_v61  ;;  %v794_v61 = vld [vmem:[%s5948_s1 + $0x1808] sm:$0xff]  ;;  %v392_v62 = vld [vmem:[%s5948_s1 + $0xb78] sm:$0xff] }
  0x9f   :  { %2846 = vmatpush1.bf16.xpose.msra.mxu1 %v2845_v5  ;;  %2416 = vmatprep.subr.bf16.mxu0 %v2415_v7  ;;  %v2435_v5 = vpack.c.bf16 %v275_v0, %v262_v63  ;;  %v2867_v7 = vpack.c.bf16 %v691_v2, %v678_v1  ;;  %v405_v63 = vld [vmem:[%s5948_s1 + $0xbe0] sm:$0xff]  ;;  %v808_v0 = vld [vmem:[%s5948_s1 + $0x1878] sm:$0xff] }
  0xa0   :  { %2848 = vmatprep.subr.bf16.mxu1 %v2847_v8  ;;  %v261_v8 = vld [vmem:[%s5948_s1 + $0x760] sm:$0xff] }
  0xa1   :  { %v2437_v17 = vpack.c.bf16 %v274_v9, %v261_v8  ;;  %v821_v1 = vld [vmem:[%s5948_s1 + $0x18e0] sm:$0xff]  ;;  %v404_v8 = vld [vmem:[%s5948_s1 + $0xbd8] sm:$0xff]  ;;  %v807_v9 = vld [vmem:[%s5948_s1 + $0x1870] sm:$0xff] }
  0xa6   :  { %2418 = vmatpush1.bf16.xpose.msra.mxu0 %v2417_v18  ;;  %v2869_v18 = vpack.c.bf16 %v690_v11, %v677_v10  ;;  %v820_v10 = vld [vmem:[%s5948_s1 + $0x18d8] sm:$0xff]  ;;  %v418_v11 = vld [vmem:[%s5948_s1 + $0xc48] sm:$0xff] }
  0xa7   :  { %2850 = vmatpush1.bf16.xpose.msra.mxu1 %v2849_v19  ;;  %2420 = vmatprep.subr.bf16.mxu0 %v2419_v22  ;;  %v2439_v19 = vpack.c.bf16 %v301_v13, %v288_v12  ;;  %v2871_v22 = vpack.c.bf16 %v717_v16, %v704_v14  ;;  %v431_v12 = vld [vmem:[%s5948_s1 + $0xcb0] sm:$0xff]  ;;  %v834_v13 = vld [vmem:[%s5948_s1 + $0x1948] sm:$0xff] }
  0xa8   :  { %2852 = vmatprep.subr.bf16.mxu1 %v2851_v23  ;;  %v287_v23 = vld [vmem:[%s5948_s1 + $0x830] sm:$0xff] }
  0xa9   :  { %v2441_v31 = vpack.c.bf16 %v300_v24, %v287_v23  ;;  %v847_v14 = vld [vmem:[%s5948_s1 + $0x19b0] sm:$0xff]  ;;  %v430_v23 = vld [vmem:[%s5948_s1 + $0xca8] sm:$0xff]  ;;  %v833_v24 = vld [vmem:[%s5948_s1 + $0x1940] sm:$0xff] }
  0xae   :  { %2422 = vmatpush1.bf16.xpose.msra.mxu0 %v2421_v32  ;;  %v2873_v32 = vpack.c.bf16 %v716_v26, %v703_v25  ;;  %v846_v25 = vld [vmem:[%s5948_s1 + $0x19a8] sm:$0xff] }
  0xaf   :  { %2854 = vmatpush1.bf16.xpose.msra.mxu1 %v2853_v33  ;;  %2424 = vmatprep.subr.bf16.mxu0 %v2423_v34  ;;  %v2443_v33 = vpack.c.bf16 %v327_v27, %v314_v20  ;;  %v2875_v34 = vpack.c.bf16 %v743_v30, %v730_v28  ;;  %v30_v26 = vld [vmem:[%s5948_s1 + $0x28] sm:$0xff]  ;;  %v43_v20 = vld [vmem:[%s5948_s1 + $0x90] sm:$0xff] }
  0xb0   :  { %2856 = vmatprep.subr.bf16.mxu1 %v2855_v35  ;;  %v313_v35 = vld [vmem:[%s5948_s1 + $0x900] sm:$0xff]  ;;  %v446_v27 = vld [vmem:[%s5948_s1 + $0xd28] sm:$0xff]  ;;  %v459_v28 = vld [vmem:[%s5948_s1 + $0xd90] sm:$0xff] }
  0xb1   :  { %v2445_v42 = vpack.c.bf16 %v326_v36, %v313_v35  ;;  %v42_v35 = vld [vmem:[%s5948_s1 + $0x88] sm:$0xff]  ;;  %v445_v36 = vld [vmem:[%s5948_s1 + $0xd20] sm:$0xff] }
  0xb6   :  { %2426 = vmatpush1.bf16.xpose.msra.mxu0 %v2425_v43  ;;  %v2877_v43 = vpack.c.bf16 %v742_v38, %v729_v37  ;;  %v4091_v37 = vld [vmem:[%s5947_s0 + $0x8] sm:$0xff] }
  0xb7   :  { %2858 = vmatpush1.bf16.xpose.msra.mxu1 %v2857_v44  ;;  %2428 = vmatprep.subr.bf16.mxu0 %v2427_v45  ;;  %v2447_v44 = vpack.c.bf16 %v353_v40, %v340_v39  ;;  %v2879_v45 = vpack.c.bf16 %v769_v41, %v756_v21  ;;  %v458_v38 = vld [vmem:[%s5948_s1 + $0xd88] sm:$0xff]  ;;  %v56_v39 = vld [vmem:[%s5948_s1 + $0xf8] sm:$0xff]  ;;  %v69_v40 = vld [vmem:[%s5948_s1 + $0x160] sm:$0xff]  ;;  %v4104_v21 = vrot.slane %v4091_v37, %v3433_v15 }
  0xb8   :  { %2860 = vmatprep.subr.bf16.mxu1 %v2859_v46  ;;  %v339_v46 = vld [vmem:[%s5948_s1 + $0x9d0] sm:$0xff]  ;;  %v472_v41 = vld [vmem:[%s5948_s1 + $0xdf8] sm:$0xff] }
  0xb9   :  { %v2449_v54 = vpack.c.bf16 %v352_v47, %v339_v46  ;;  %v893_v47 = vcombine.high %v4104_v21, %v4104_v21 }
  0xbe   :  { %2430 = vmatpush1.bf16.xpose.msra.mxu0 %v2429_v55  ;;  %v2881_v55 = vpack.c.bf16 %v768_v49, %v755_v48  ;;  %v55_v48 = vld [vmem:[%s5948_s1 + $0xf0] sm:$0xff]  ;;  %v68_v49 = vld [vmem:[%s5948_s1 + $0x158] sm:$0xff] }
  0xbf   :  { %2862 = vmatpush1.bf16.xpose.msra.mxu1 %v2861_v56  ;;  %2432 = vmatprep.subr.bf16.mxu0 %v2431_v57  ;;  %v2451_v56 = vpack.c.bf16 %v379_v51, %v366_v50  ;;  %v2883_v57 = vpack.c.bf16 %v795_v53, %v782_v52  ;;  %v471_v50 = vld [vmem:[%s5948_s1 + $0xdf0] sm:$0xff]  ;;  %v484_v51 = vld [vmem:[%s5948_s1 + $0xe58] sm:$0xff]  ;;  %v498_v53 = vld [vmem:[%s5948_s1 + $0xec8] sm:$0xff] }
  0xc0   :  { %2864 = vmatprep.subr.bf16.mxu1 %v2863_v58  ;;  %v365_v58 = vld [vmem:[%s5948_s1 + $0xaa0] sm:$0xff]  ;;  %v95_v52 = vld [vmem:[%s5948_s1 + $0x230] sm:$0xff] }
  0xc1   :  { %v2453_v2 = vpack.c.bf16 %v378_v59, %v365_v58  ;;  %v81_v59 = vld [vmem:[%s5948_s1 + $0x1c0] sm:$0xff] }
  0xc6   :  { %2434 = vmatpush1.bf16.xpose.msra.mxu0 %v2433_v3  ;;  %v2885_v3 = vpack.c.bf16 %v794_v61, %v781_v60  ;;  %v94_v60 = vld [vmem:[%s5948_s1 + $0x228] sm:$0xff]  ;;  %v497_v61 = vld [vmem:[%s5948_s1 + $0xec0] sm:$0xff] }
  0xc7   :  { %2866 = vmatpush1.bf16.xpose.msra.mxu1 %v2865_v4  ;;  %2436 = vmatprep.subr.bf16.mxu0 %v2435_v5  ;;  %v2455_v4 = vpack.c.bf16 %v405_v63, %v392_v62  ;;  %v2887_v5 = vpack.c.bf16 %v821_v1, %v808_v0  ;;  %v510_v62 = vld [vmem:[%s5948_s1 + $0xf28] sm:$0xff]  ;;  %v108_v63 = vld [vmem:[%s5948_s1 + $0x298] sm:$0xff]  ;;  %v121_v0 = vld [vmem:[%s5948_s1 + $0x300] sm:$0xff] }
  0xc8   :  { %2868 = vmatprep.subr.bf16.mxu1 %v2867_v7  ;;  %v391_v7 = vld [vmem:[%s5948_s1 + $0xb70] sm:$0xff]  ;;  %v524_v1 = vld [vmem:[%s5948_s1 + $0xf98] sm:$0xff] }
  0xc9   :  { %v2457_v16 = vpack.c.bf16 %v404_v8, %v391_v7  ;;  %v107_v8 = vld [vmem:[%s5948_s1 + $0x290] sm:$0xff] }
  0xce   :  { %2438 = vmatpush1.bf16.xpose.msra.mxu0 %v2437_v17  ;;  %v2889_v17 = vpack.c.bf16 %v820_v10, %v807_v9  ;;  %v120_v9 = vld [vmem:[%s5948_s1 + $0x2f8] sm:$0xff]  ;;  %v523_v10 = vld [vmem:[%s5948_s1 + $0xf90] sm:$0xff] }
  0xcf   :  { %2870 = vmatpush1.bf16.xpose.msra.mxu1 %v2869_v18  ;;  %2440 = vmatprep.subr.bf16.mxu0 %v2439_v19  ;;  %v2459_v18 = vpack.c.bf16 %v431_v12, %v418_v11  ;;  %v2891_v19 = vpack.c.bf16 %v847_v14, %v834_v13  ;;  %v536_v11 = vld [vmem:[%s5948_s1 + $0xff8] sm:$0xff]  ;;  %v134_v12 = vld [vmem:[%s5948_s1 + $0x368] sm:$0xff]  ;;  %v147_v13 = vld [vmem:[%s5948_s1 + $0x3d0] sm:$0xff] }
  0xd0   :  { %2872 = vmatprep.subr.bf16.mxu1 %v2871_v22  ;;  %v417_v22 = vld [vmem:[%s5948_s1 + $0xc40] sm:$0xff]  ;;  %v550_v14 = vld [vmem:[%s5948_s1 + $0x1068] sm:$0xff] }
  0xd1   :  { %v2461_v30 = vpack.c.bf16 %v430_v23, %v417_v22  ;;  %v133_v23 = vld [vmem:[%s5948_s1 + $0x360] sm:$0xff] }
  0xd6   :  { %2442 = vmatpush1.bf16.xpose.msra.mxu0 %v2441_v31  ;;  %v2893_v31 = vpack.c.bf16 %v846_v25, %v833_v24  ;;  %v146_v24 = vld [vmem:[%s5948_s1 + $0x3c8] sm:$0xff]  ;;  %v549_v25 = vld [vmem:[%s5948_s1 + $0x1060] sm:$0xff] }
  0xd7   :  { %2874 = vmatpush1.bf16.xpose.msra.mxu1 %v2873_v32  ;;  %2444 = vmatprep.subr.bf16.mxu0 %v2443_v33  ;;  %v2463_v32 = vpack.c.bf16 %v43_v20, %v30_v26  ;;  %v2895_v33 = vpack.c.bf16 %v459_v28, %v446_v27  ;;  %v562_v26 = vld [vmem:[%s5948_s1 + $0x10c8] sm:$0xff]  ;;  %v160_v20 = vld [vmem:[%s5948_s1 + $0x438] sm:$0xff]  ;;  %v173_v27 = vld [vmem:[%s5948_s1 + $0x4a0] sm:$0xff] }
  0xd8   :  { %2876 = vmatprep.subr.bf16.mxu1 %v2875_v34  ;;  %v29_v34 = vld [vmem:[%s5948_s1 + $0x20] sm:$0xff]  ;;  %v576_v28 = vld [vmem:[%s5948_s1 + $0x1138] sm:$0xff] }
  0xde   :  { %2446 = vmatpush1.bf16.xpose.msra.mxu0 %v2445_v42  ;;  %v485_v42 = vld [vmem:[%s5948_s1 + $0xe60] sm:$0xff] }
  0xdf   :  { %2878 = vmatpush1.bf16.xpose.msra.mxu1 %v2877_v43  ;;  %2448 = vmatprep.subr.bf16.mxu0 %v2447_v44  ;;  %v2465_v43 = vpack.c.bf16 %v42_v35, %v29_v34  ;;  %v2897_v44 = vpack.c.bf16 %v458_v38, %v445_v36  ;;  %v2899_v46 = vpack.c.bf16 %v485_v42, %v472_v41  ;;  %v159_v35 = vld [vmem:[%s5948_s1 + $0x430] sm:$0xff]  ;;  %v172_v36 = vld [vmem:[%s5948_s1 + $0x498] sm:$0xff]  ;;  %v602_v42 = vld [vmem:[%s5948_s1 + $0x1208] sm:$0xff] }
  0xe0   :  { %2880 = vmatprep.subr.bf16.mxu1 %v2879_v45  ;;  %v2467_v45 = vpack.c.bf16 %v69_v40, %v56_v39  ;;  %v575_v38 = vld [vmem:[%s5948_s1 + $0x1130] sm:$0xff]  ;;  %v588_v39 = vld [vmem:[%s5948_s1 + $0x1198] sm:$0xff]  ;;  %v186_v40 = vld [vmem:[%s5948_s1 + $0x508] sm:$0xff] }
  0xe1   :  { %v199_v41 = vld [vmem:[%s5948_s1 + $0x570] sm:$0xff] }
  0xe6   :  { %2450 = vmatpush1.bf16.xpose.msra.mxu0 %v2449_v54  ;;  %v511_v54 = vld [vmem:[%s5948_s1 + $0xf30] sm:$0xff] }
  0xe7   :  { %2882 = vmatpush1.bf16.xpose.msra.mxu1 %v2881_v55  ;;  %2452 = vmatprep.subr.bf16.mxu0 %v2451_v56  ;;  %v2469_v55 = vpack.c.bf16 %v68_v49, %v55_v48  ;;  %v2901_v56 = vpack.c.bf16 %v484_v51, %v471_v50  ;;  %v2903_v58 = vpack.c.bf16 %v511_v54, %v498_v53  ;;  %v185_v48 = vld [vmem:[%s5948_s1 + $0x500] sm:$0xff]  ;;  %v198_v49 = vld [vmem:[%s5948_s1 + $0x568] sm:$0xff]  ;;  %v628_v53 = vld [vmem:[%s5948_s1 + $0x12d8] sm:$0xff] }
  0xe8   :  { %2884 = vmatprep.subr.bf16.mxu1 %v2883_v57  ;;  %v601_v50 = vld [vmem:[%s5948_s1 + $0x1200] sm:$0xff]  ;;  %v614_v51 = vld [vmem:[%s5948_s1 + $0x1268] sm:$0xff] }
  0xe9   :  { %v641_v54 = vld [vmem:[%s5948_s1 + $0x1340] sm:$0xff] }
  0xee   :  { %2454 = vmatpush1.bf16.xpose.msra.mxu0 %v2453_v2  ;;  %v537_v2 = vld [vmem:[%s5948_s1 + $0x1000] sm:$0xff] }
  0xef   :  { %2886 = vmatpush1.bf16.xpose.msra.mxu1 %v2885_v3  ;;  %2456 = vmatprep.subr.bf16.mxu0 %v2455_v4  ;;  %v2473_v3 = vpack.c.bf16 %v94_v60, %v81_v59  ;;  %v2905_v4 = vpack.c.bf16 %v510_v62, %v497_v61  ;;  %v2907_v7 = vpack.c.bf16 %v537_v2, %v524_v1  ;;  %v211_v59 = vld [vmem:[%s5948_s1 + $0x5d0] sm:$0xff]  ;;  %v224_v60 = vld [vmem:[%s5948_s1 + $0x638] sm:$0xff]  ;;  %v654_v1 = vld [vmem:[%s5948_s1 + $0x13a8] sm:$0xff] }
  0xf0   :  { %2888 = vmatprep.subr.bf16.mxu1 %v2887_v5  ;;  %v2475_v5 = vpack.c.bf16 %v121_v0, %v108_v63  ;;  %v627_v61 = vld [vmem:[%s5948_s1 + $0x12d0] sm:$0xff]  ;;  %v640_v62 = vld [vmem:[%s5948_s1 + $0x1338] sm:$0xff]  ;;  %v238_v63 = vld [vmem:[%s5948_s1 + $0x6a8] sm:$0xff] }
  0xf1   :  { %v251_v0 = vld [vmem:[%s5948_s1 + $0x710] sm:$0xff] }
  0xf2   :  { %v667_v2 = vld [vmem:[%s5948_s1 + $0x1410] sm:$0xff] }
  0xf6   :  { %2458 = vmatpush1.bf16.xpose.msra.mxu0 %v2457_v16  ;;  %v563_v16 = vld [vmem:[%s5948_s1 + $0x10d0] sm:$0xff] }
  0xf7   :  { %2890 = vmatpush1.bf16.xpose.msra.mxu1 %v2889_v17  ;;  %2460 = vmatprep.subr.bf16.mxu0 %v2459_v18  ;;  %v2477_v17 = vpack.c.bf16 %v120_v9, %v107_v8  ;;  %v2909_v18 = vpack.c.bf16 %v536_v11, %v523_v10  ;;  %v2911_v22 = vpack.c.bf16 %v563_v16, %v550_v14  ;;  %v237_v8 = vld [vmem:[%s5948_s1 + $0x6a0] sm:$0xff]  ;;  %v250_v9 = vld [vmem:[%s5948_s1 + $0x708] sm:$0xff]  ;;  %v680_v14 = vld [vmem:[%s5948_s1 + $0x1478] sm:$0xff] }
  0xf8   :  { %2892 = vmatprep.subr.bf16.mxu1 %v2891_v19  ;;  %v2479_v19 = vpack.c.bf16 %v147_v13, %v134_v12  ;;  %v653_v10 = vld [vmem:[%s5948_s1 + $0x13a0] sm:$0xff]  ;;  %v666_v11 = vld [vmem:[%s5948_s1 + $0x1408] sm:$0xff]  ;;  %v264_v12 = vld [vmem:[%s5948_s1 + $0x778] sm:$0xff] }
  0xf9   :  { %v277_v13 = vld [vmem:[%s5948_s1 + $0x7e0] sm:$0xff] }
  0xfa   :  { %v693_v16 = vld [vmem:[%s5948_s1 + $0x14e0] sm:$0xff] }
  0xfe   :  { %2462 = vmatpush1.bf16.xpose.msra.mxu0 %v2461_v30  ;;  %v589_v30 = vld [vmem:[%s5948_s1 + $0x11a0] sm:$0xff] }
  0xff   :  { %2894 = vmatpush1.bf16.xpose.msra.mxu1 %v2893_v31  ;;  %2464 = vmatprep.subr.bf16.mxu0 %v2463_v32  ;;  %v2481_v31 = vpack.c.bf16 %v146_v24, %v133_v23  ;;  %v2913_v32 = vpack.c.bf16 %v562_v26, %v549_v25  ;;  %v2915_v34 = vpack.c.bf16 %v589_v30, %v576_v28  ;;  %v263_v23 = vld [vmem:[%s5948_s1 + $0x770] sm:$0xff]  ;;  %v276_v24 = vld [vmem:[%s5948_s1 + $0x7d8] sm:$0xff]  ;;  %v706_v28 = vld [vmem:[%s5948_s1 + $0x1548] sm:$0xff] }
 0x100   :  { %2896 = vmatprep.subr.bf16.mxu1 %v2895_v33  ;;  %v2483_v33 = vpack.c.bf16 %v173_v27, %v160_v20  ;;  %v679_v25 = vld [vmem:[%s5948_s1 + $0x1470] sm:$0xff]  ;;  %v692_v26 = vld [vmem:[%s5948_s1 + $0x14d8] sm:$0xff]  ;;  %v290_v20 = vld [vmem:[%s5948_s1 + $0x848] sm:$0xff] }
 0x101   :  { %v303_v27 = vld [vmem:[%s5948_s1 + $0x8b0] sm:$0xff] }
 0x102   :  { %v719_v30 = vld [vmem:[%s5948_s1 + $0x15b0] sm:$0xff] }
 0x105   :  { %1262 = vmatmul.mubr.f32.vlgmr.msra.gmra.mrb[0].mxu0 %v3707_v29 }
 0x106   :  { %2466 = vmatpush1.bf16.xpose.msra.mxu0 %v2465_v43  ;;  %1759 = vmatmul.mubr.f32.vlgmr.msra.gmra.mrb[0].mxu1 %v3707_v29  ;;  %v82_v29 = vld [vmem:[%s5948_s1 + $0x1c8] sm:$0xff]  ;;  %v615_v43 = vld [vmem:[%s5948_s1 + $0x1270] sm:$0xff] }
 0x107   :  { %2898 = vmatpush1.bf16.xpose.msra.mxu1 %v2897_v44  ;;  %2468 = vmatprep.subr.bf16.mxu0 %v2467_v45  ;;  %v2471_v57 = vpack.c.bf16 %v95_v52, %v82_v29  ;;  %v2485_v44 = vpack.c.bf16 %v172_v36, %v159_v35  ;;  %v2917_v45 = vpack.c.bf16 %v588_v39, %v575_v38  ;;  %v212_v29 = vld [vmem:[%s5948_s1 + $0x5d8] sm:$0xff]  ;;  %v225_v52 = vld [vmem:[%s5948_s1 + $0x640] sm:$0xff]  ;;  %v302_v36 = vld [vmem:[%s5948_s1 + $0x8a8] sm:$0xff] }
 0x108   :  { %2900 = vmatprep.subr.bf16.mxu1 %v2899_v46  ;;  %1332 = vmatprep.mubr.f32.mxu0 %v893_v47  ;;  %v2487_v46 = vpack.c.bf16 %v199_v41, %v186_v40  ;;  %v289_v35 = vld [vmem:[%s5948_s1 + $0x840] sm:$0xff]  ;;  %v718_v39 = vld [vmem:[%s5948_s1 + $0x15a8] sm:$0xff]  ;;  %v316_v40 = vld [vmem:[%s5948_s1 + $0x918] sm:$0xff] }
 0x109   :  { %1829 = vmatprep.mubr.f32.mxu1 %v893_v47  ;;  %v2919_v47 = vpack.c.bf16 %v615_v43, %v602_v42  ;;  %v705_v38 = vld [vmem:[%s5948_s1 + $0x1540] sm:$0xff]  ;;  %v732_v42 = vld [vmem:[%s5948_s1 + $0x1618] sm:$0xff] }
 0x10a   :  { %v329_v41 = vld [vmem:[%s5948_s1 + $0x980] sm:$0xff] }
 0x10b   :  { %v745_v43 = vld [vmem:[%s5948_s1 + $0x1680] sm:$0xff] }
 0x10e   :  { %2470 = vmatpush1.bf16.xpose.msra.mxu0 %v2469_v55  ;;  %v2489_v55 = vpack.c.bf16 %v198_v49, %v185_v48  ;;  %v315_v48 = vld [vmem:[%s5948_s1 + $0x910] sm:$0xff]  ;;  %v328_v49 = vld [vmem:[%s5948_s1 + $0x978] sm:$0xff] }
 0x10f   :  { %2902 = vmatpush1.bf16.xpose.msra.mxu1 %v2901_v56  ;;  %2472 = vmatprep.subr.bf16.mxu0 %v2471_v57  ;;  %v2921_v56 = vpack.c.bf16 %v614_v51, %v601_v50  ;;  %v2491_v57 = vpack.c.bf16 %v225_v52, %v212_v29  ;;  %v731_v50 = vld [vmem:[%s5948_s1 + $0x1610] sm:$0xff]  ;;  %v744_v51 = vld [vmem:[%s5948_s1 + $0x1678] sm:$0xff]  ;;  %v342_v29 = vld [vmem:[%s5948_s1 + $0x9e8] sm:$0xff] }
 0x110   :  { %2904 = vmatprep.subr.bf16.mxu1 %v2903_v58  ;;  %v2923_v58 = vpack.c.bf16 %v641_v54, %v628_v53  ;;  %v355_v52 = vld [vmem:[%s5948_s1 + $0xa50] sm:$0xff]  ;;  %v758_v53 = vld [vmem:[%s5948_s1 + $0x16e8] sm:$0xff] }
 0x111   :  { %v771_v54 = vld [vmem:[%s5948_s1 + $0x1750] sm:$0xff] }
 0x116   :  { %2474 = vmatpush1.bf16.xpose.msra.mxu0 %v2473_v3  ;;  %v2493_v3 = vpack.c.bf16 %v224_v60, %v211_v59  ;;  %v341_v59 = vld [vmem:[%s5948_s1 + $0x9e0] sm:$0xff]  ;;  %v354_v60 = vld [vmem:[%s5948_s1 + $0xa48] sm:$0xff] }
 0x117   :  { %2906 = vmatpush1.bf16.xpose.msra.mxu1 %v2905_v4  ;;  %2476 = vmatprep.subr.bf16.mxu0 %v2475_v5  ;;  %v2925_v4 = vpack.c.bf16 %v640_v62, %v627_v61  ;;  %v2495_v5 = vpack.c.bf16 %v251_v0, %v238_v63  ;;  %v757_v61 = vld [vmem:[%s5948_s1 + $0x16e0] sm:$0xff]  ;;  %v770_v62 = vld [vmem:[%s5948_s1 + $0x1748] sm:$0xff]  ;;  %v368_v63 = vld [vmem:[%s5948_s1 + $0xab8] sm:$0xff] }
 0x118   :  { %2908 = vmatprep.subr.bf16.mxu1 %v2907_v7  ;;  %v2927_v7 = vpack.c.bf16 %v667_v2, %v654_v1  ;;  %v381_v0 = vld [vmem:[%s5948_s1 + $0xb20] sm:$0xff]  ;;  %v784_v1 = vld [vmem:[%s5948_s1 + $0x17b8] sm:$0xff] }
 0x119   :  { %v797_v2 = vld [vmem:[%s5948_s1 + $0x1820] sm:$0xff] }
 0x11e   :  { %2478 = vmatpush1.bf16.xpose.msra.mxu0 %v2477_v17  ;;  %v2497_v17 = vpack.c.bf16 %v250_v9, %v237_v8  ;;  %v367_v8 = vld [vmem:[%s5948_s1 + $0xab0] sm:$0xff]  ;;  %v380_v9 = vld [vmem:[%s5948_s1 + $0xb18] sm:$0xff] }
 0x11f   :  { %2910 = vmatpush1.bf16.xpose.msra.mxu1 %v2909_v18  ;;  %2480 = vmatprep.subr.bf16.mxu0 %v2479_v19  ;;  %v2929_v18 = vpack.c.bf16 %v666_v11, %v653_v10  ;;  %v2499_v19 = vpack.c.bf16 %v277_v13, %v264_v12  ;;  %v783_v10 = vld [vmem:[%s5948_s1 + $0x17b0] sm:$0xff]  ;;  %v796_v11 = vld [vmem:[%s5948_s1 + $0x1818] sm:$0xff]  ;;  %v394_v12 = vld [vmem:[%s5948_s1 + $0xb88] sm:$0xff] }
 0x120   :  { %2912 = vmatprep.subr.bf16.mxu1 %v2911_v22  ;;  %v2931_v22 = vpack.c.bf16 %v693_v16, %v680_v14  ;;  %v407_v13 = vld [vmem:[%s5948_s1 + $0xbf0] sm:$0xff]  ;;  %v810_v14 = vld [vmem:[%s5948_s1 + $0x1888] sm:$0xff] }
 0x121   :  { %v823_v16 = vld [vmem:[%s5948_s1 + $0x18f0] sm:$0xff] }
 0x126   :  { %2482 = vmatpush1.bf16.xpose.msra.mxu0 %v2481_v31  ;;  %v2501_v31 = vpack.c.bf16 %v276_v24, %v263_v23  ;;  %v393_v23 = vld [vmem:[%s5948_s1 + $0xb80] sm:$0xff]  ;;  %v406_v24 = vld [vmem:[%s5948_s1 + $0xbe8] sm:$0xff] }
 0x127   :  { %2914 = vmatpush1.bf16.xpose.msra.mxu1 %v2913_v32  ;;  %2484 = vmatprep.subr.bf16.mxu0 %v2483_v33  ;;  %v2933_v32 = vpack.c.bf16 %v692_v26, %v679_v25  ;;  %v2503_v33 = vpack.c.bf16 %v303_v27, %v290_v20  ;;  %v809_v25 = vld [vmem:[%s5948_s1 + $0x1880] sm:$0xff]  ;;  %v822_v26 = vld [vmem:[%s5948_s1 + $0x18e8] sm:$0xff]  ;;  %v420_v20 = vld [vmem:[%s5948_s1 + $0xc58] sm:$0xff] }
 0x128   :  { %2916 = vmatprep.subr.bf16.mxu1 %v2915_v34  ;;  %v2935_v34 = vpack.c.bf16 %v719_v30, %v706_v28  ;;  %v433_v27 = vld [vmem:[%s5948_s1 + $0xcc0] sm:$0xff]  ;;  %v836_v28 = vld [vmem:[%s5948_s1 + $0x1958] sm:$0xff] }
 0x129   :  { %v849_v30 = vld [vmem:[%s5948_s1 + $0x19c0] sm:$0xff] }
 0x12e   :  { %2486 = vmatpush1.bf16.xpose.msra.mxu0 %v2485_v44  ;;  %v2505_v44 = vpack.c.bf16 %v302_v36, %v289_v35  ;;  %v419_v35 = vld [vmem:[%s5948_s1 + $0xc50] sm:$0xff]  ;;  %v432_v36 = vld [vmem:[%s5948_s1 + $0xcb8] sm:$0xff] }
 0x12f   :  { %2918 = vmatpush1.bf16.xpose.msra.mxu1 %v2917_v45  ;;  %2488 = vmatprep.subr.bf16.mxu0 %v2487_v46  ;;  %v2937_v45 = vpack.c.bf16 %v718_v39, %v705_v38  ;;  %v2507_v46 = vpack.c.bf16 %v329_v41, %v316_v40  ;;  %v835_v38 = vld [vmem:[%s5948_s1 + $0x1950] sm:$0xff]  ;;  %v848_v39 = vld [vmem:[%s5948_s1 + $0x19b8] sm:$0xff]  ;;  %v45_v41 = vld [vmem:[%s5948_s1 + $0xa0] sm:$0xff] }
 0x130   :  { %2920 = vmatprep.subr.bf16.mxu1 %v2919_v47  ;;  %v2939_v47 = vpack.c.bf16 %v745_v43, %v732_v42  ;;  %v32_v40 = vld [vmem:[%s5948_s1 + $0x38] sm:$0xff]  ;;  %v461_v43 = vld [vmem:[%s5948_s1 + $0xda0] sm:$0xff] }
 0x131   :  { %v448_v42 = vld [vmem:[%s5948_s1 + $0xd38] sm:$0xff] }
 0x136   :  { %2490 = vmatpush1.bf16.xpose.msra.mxu0 %v2489_v55  ;;  %v2509_v55 = vpack.c.bf16 %v328_v49, %v315_v48  ;;  %v31_v48 = vld [vmem:[%s5948_s1 + $0x30] sm:$0xff]  ;;  %v44_v49 = vld [vmem:[%s5948_s1 + $0x98] sm:$0xff] }
 0x137   :  { %2922 = vmatpush1.bf16.xpose.msra.mxu1 %v2921_v56  ;;  %2492 = vmatprep.subr.bf16.mxu0 %v2491_v57  ;;  %v2941_v56 = vpack.c.bf16 %v744_v51, %v731_v50  ;;  %v2511_v57 = vpack.c.bf16 %v355_v52, %v342_v29  ;;  %v447_v50 = vld [vmem:[%s5948_s1 + $0xd30] sm:$0xff]  ;;  %v878_v51 = vcombine.high %v4091_v37, %v4091_v37  ;;  %v460_v29 = vld [vmem:[%s5948_s1 + $0xd98] sm:$0xff]  ;;  %v58_v52 = vld [vmem:[%s5948_s1 + $0x108] sm:$0xff] }
 0x138   :  { %2924 = vmatprep.subr.bf16.mxu1 %v2923_v58  ;;  %v2943_v58 = vpack.c.bf16 %v771_v54, %v758_v53  ;;  %v71_v53 = vld [vmem:[%s5948_s1 + $0x170] sm:$0xff]  ;;  %v474_v54 = vld [vmem:[%s5948_s1 + $0xe08] sm:$0xff] }
 0x139   :  { %v487_v37 = vld [vmem:[%s5948_s1 + $0xe70] sm:$0xff] }
 0x13e   :  { %2494 = vmatpush1.bf16.xpose.msra.mxu0 %v2493_v3  ;;  %v2513_v3 = vpack.c.bf16 %v354_v60, %v341_v59  ;;  %v2963_v59 = vpack.c.bf16 %v487_v37, %v474_v54  ;;  %v604_v54 = vld [vmem:[%s5948_s1 + $0x1218] sm:$0xff]  ;;  %v617_v37 = vld [vmem:[%s5948_s1 + $0x1280] sm:$0xff] }
 0x13f   :  { %2926 = vmatpush1.bf16.xpose.msra.mxu1 %v2925_v4  ;;  %2496 = vmatprep.subr.bf16.mxu0 %v2495_v5  ;;  %v2945_v4 = vpack.c.bf16 %v770_v62, %v757_v61  ;;  %v2515_v5 = vpack.c.bf16 %v381_v0, %v368_v63  ;;  %v57_v61 = vld [vmem:[%s5948_s1 + $0x100] sm:$0xff]  ;;  %v70_v62 = vld [vmem:[%s5948_s1 + $0x168] sm:$0xff] }
 0x140   :  { %2928 = vmatprep.subr.bf16.mxu1 %v2927_v7  ;;  %v2947_v7 = vpack.c.bf16 %v797_v2, %v784_v1  ;;  %v473_v63 = vld [vmem:[%s5948_s1 + $0xe00] sm:$0xff]  ;;  %v486_v0 = vld [vmem:[%s5948_s1 + $0xe68] sm:$0xff]  ;;  %v500_v2 = vld [vmem:[%s5948_s1 + $0xed8] sm:$0xff] }
 0x141   :  { %v97_v1 = vld [vmem:[%s5948_s1 + $0x240] sm:$0xff] }
 0x146   :  { %2498 = vmatpush1.bf16.xpose.msra.mxu0 %v2497_v17  ;;  %v2517_v17 = vpack.c.bf16 %v380_v9, %v367_v8  ;;  %v83_v9 = vld [vmem:[%s5948_s1 + $0x1d0] sm:$0xff] }
 0x147   :  { %2930 = vmatpush1.bf16.xpose.msra.mxu1 %v2929_v18  ;;  %2500 = vmatprep.subr.bf16.mxu0 %v2499_v19  ;;  %v2949_v18 = vpack.c.bf16 %v796_v11, %v783_v10  ;;  %v2519_v19 = vpack.c.bf16 %v407_v13, %v394_v12  ;;  %v96_v10 = vld [vmem:[%s5948_s1 + $0x238] sm:$0xff]  ;;  %v499_v11 = vld [vmem:[%s5948_s1 + $0xed0] sm:$0xff]  ;;  %v110_v13 = vld [vmem:[%s5948_s1 + $0x2a8] sm:$0xff] }
 0x148   :  { %2932 = vmatprep.subr.bf16.mxu1 %v2931_v22  ;;  %v2951_v22 = vpack.c.bf16 %v823_v16, %v810_v14  ;;  %v512_v12 = vld [vmem:[%s5948_s1 + $0xf38] sm:$0xff]  ;;  %v123_v14 = vld [vmem:[%s5948_s1 + $0x310] sm:$0xff]  ;;  %v526_v16 = vld [vmem:[%s5948_s1 + $0xfa8] sm:$0xff] }
 0x14e   :  { %2502 = vmatpush1.bf16.xpose.msra.mxu0 %v2501_v31  ;;  %v2521_v31 = vpack.c.bf16 %v406_v24, %v393_v23  ;;  %v109_v24 = vld [vmem:[%s5948_s1 + $0x2a0] sm:$0xff] }
 0x14f   :  { %2934 = vmatpush1.bf16.xpose.msra.mxu1 %v2933_v32  ;;  %2504 = vmatprep.subr.bf16.mxu0 %v2503_v33  ;;  %v2953_v32 = vpack.c.bf16 %v822_v26, %v809_v25  ;;  %v2523_v33 = vpack.c.bf16 %v433_v27, %v420_v20  ;;  %v122_v25 = vld [vmem:[%s5948_s1 + $0x308] sm:$0xff]  ;;  %v525_v26 = vld [vmem:[%s5948_s1 + $0xfa0] sm:$0xff]  ;;  %v136_v27 = vld [vmem:[%s5948_s1 + $0x378] sm:$0xff] }
 0x150   :  { %2936 = vmatprep.subr.bf16.mxu1 %v2935_v34  ;;  %v2955_v34 = vpack.c.bf16 %v849_v30, %v836_v28  ;;  %v538_v20 = vld [vmem:[%s5948_s1 + $0x1008] sm:$0xff]  ;;  %v149_v28 = vld [vmem:[%s5948_s1 + $0x3e0] sm:$0xff]  ;;  %v552_v30 = vld [vmem:[%s5948_s1 + $0x1078] sm:$0xff] }
 0x156   :  { %2506 = vmatpush1.bf16.xpose.msra.mxu0 %v2505_v44  ;;  %v2525_v44 = vpack.c.bf16 %v432_v36, %v419_v35  ;;  %v135_v36 = vld [vmem:[%s5948_s1 + $0x370] sm:$0xff] }
 0x157   :  { %2938 = vmatpush1.bf16.xpose.msra.mxu1 %v2937_v45  ;;  %2508 = vmatprep.subr.bf16.mxu0 %v2507_v46  ;;  %v2957_v45 = vpack.c.bf16 %v848_v39, %v835_v38  ;;  %v2527_v46 = vpack.c.bf16 %v45_v41, %v32_v40  ;;  %v148_v38 = vld [vmem:[%s5948_s1 + $0x3d8] sm:$0xff]  ;;  %v551_v39 = vld [vmem:[%s5948_s1 + $0x1070] sm:$0xff]  ;;  %v162_v41 = vld [vmem:[%s5948_s1 + $0x448] sm:$0xff] }
 0x158   :  { %2940 = vmatprep.subr.bf16.mxu1 %v2939_v47  ;;  %v2959_v47 = vpack.c.bf16 %v461_v43, %v448_v42  ;;  %v564_v40 = vld [vmem:[%s5948_s1 + $0x10d8] sm:$0xff]  ;;  %v175_v42 = vld [vmem:[%s5948_s1 + $0x4b0] sm:$0xff]  ;;  %v578_v43 = vld [vmem:[%s5948_s1 + $0x1148] sm:$0xff] }
 0x15e   :  { %2510 = vmatpush1.bf16.xpose.msra.mxu0 %v2509_v55  ;;  %v4503_v55 = vrot.slane %v878_v51, %v3433_v15  ;;  %v577_v51 = vld [vmem:[%s5948_s1 + $0x1140] sm:$0xff] }
 0x15f   :  { %2942 = vmatpush1.bf16.xpose.msra.mxu1 %v2941_v56  ;;  %2512 = vmatprep.subr.bf16.mxu0 %v2511_v57  ;;  %v2529_v56 = vpack.c.bf16 %v44_v49, %v31_v48  ;;  %v2961_v57 = vpack.c.bf16 %v460_v29, %v447_v50  ;;  %v161_v49 = vld [vmem:[%s5948_s1 + $0x440] sm:$0xff]  ;;  %v174_v50 = vld [vmem:[%s5948_s1 + $0x4a8] sm:$0xff] }
 0x160   :  { %2944 = vmatprep.subr.bf16.mxu1 %v2943_v58  ;;  %v2531_v58 = vpack.c.bf16 %v71_v53, %v58_v52  ;;  %v894_v60 = vcombine.high %v4503_v55, %v4503_v55  ;;  %v590_v29 = vld [vmem:[%s5948_s1 + $0x11a8] sm:$0xff]  ;;  %v188_v52 = vld [vmem:[%s5948_s1 + $0x518] sm:$0xff]  ;;  %v201_v53 = vld [vmem:[%s5948_s1 + $0x580] sm:$0xff] }
 0x166   :  { %2514 = vmatpush1.bf16.xpose.msra.mxu0 %v2513_v3  ;;  %v513_v3 = vld [vmem:[%s5948_s1 + $0xf40] sm:$0xff] }
 0x167   :  { %2946 = vmatpush1.bf16.xpose.msra.mxu1 %v2945_v4  ;;  %2516 = vmatprep.subr.bf16.mxu0 %v2515_v5  ;;  %v2533_v4 = vpack.c.bf16 %v70_v62, %v57_v61  ;;  %v2965_v5 = vpack.c.bf16 %v486_v0, %v473_v63  ;;  %v2967_v8 = vpack.c.bf16 %v513_v3, %v500_v2  ;;  %v200_v61 = vld [vmem:[%s5948_s1 + $0x578] sm:$0xff]  ;;  %v603_v62 = vld [vmem:[%s5948_s1 + $0x1210] sm:$0xff]  ;;  %v214_v0 = vld [vmem:[%s5948_s1 + $0x5e8] sm:$0xff] }
 0x168   :  { %2948 = vmatprep.subr.bf16.mxu1 %v2947_v7  ;;  %v616_v63 = vld [vmem:[%s5948_s1 + $0x1278] sm:$0xff]  ;;  %v643_v2 = vld [vmem:[%s5948_s1 + $0x1350] sm:$0xff] }
 0x16e   :  { %2518 = vmatpush1.bf16.xpose.msra.mxu0 %v2517_v17  ;;  %v539_v17 = vld [vmem:[%s5948_s1 + $0x1010] sm:$0xff] }
 0x16f   :  { %2950 = vmatpush1.bf16.xpose.msra.mxu1 %v2949_v18  ;;  %2520 = vmatprep.subr.bf16.mxu0 %v2519_v19  ;;  %v2537_v18 = vpack.c.bf16 %v96_v10, %v83_v9  ;;  %v2969_v19 = vpack.c.bf16 %v512_v12, %v499_v11  ;;  %v2971_v23 = vpack.c.bf16 %v539_v17, %v526_v16  ;;  %v226_v9 = vld [vmem:[%s5948_s1 + $0x648] sm:$0xff]  ;;  %v629_v10 = vld [vmem:[%s5948_s1 + $0x12e0] sm:$0xff]  ;;  %v240_v12 = vld [vmem:[%s5948_s1 + $0x6b8] sm:$0xff] }
 0x170   :  { %2952 = vmatprep.subr.bf16.mxu1 %v2951_v22  ;;  %v2539_v22 = vpack.c.bf16 %v123_v14, %v110_v13  ;;  %v642_v11 = vld [vmem:[%s5948_s1 + $0x1348] sm:$0xff]  ;;  %v253_v13 = vld [vmem:[%s5948_s1 + $0x720] sm:$0xff]  ;;  %v656_v14 = vld [vmem:[%s5948_s1 + $0x13b8] sm:$0xff] }
 0x171   :  { %v669_v16 = vld [vmem:[%s5948_s1 + $0x1420] sm:$0xff] }
 0x176   :  { %2522 = vmatpush1.bf16.xpose.msra.mxu0 %v2521_v31  ;;  %v565_v31 = vld [vmem:[%s5948_s1 + $0x10e0] sm:$0xff] }
 0x177   :  { %2954 = vmatpush1.bf16.xpose.msra.mxu1 %v2953_v32  ;;  %2524 = vmatprep.subr.bf16.mxu0 %v2523_v33  ;;  %v2541_v32 = vpack.c.bf16 %v122_v25, %v109_v24  ;;  %v2973_v33 = vpack.c.bf16 %v538_v20, %v525_v26  ;;  %v2975_v35 = vpack.c.bf16 %v565_v31, %v552_v30  ;;  %v252_v24 = vld [vmem:[%s5948_s1 + $0x718] sm:$0xff]  ;;  %v655_v25 = vld [vmem:[%s5948_s1 + $0x13b0] sm:$0xff]  ;;  %v266_v20 = vld [vmem:[%s5948_s1 + $0x788] sm:$0xff] }
 0x178   :  { %2956 = vmatprep.subr.bf16.mxu1 %v2955_v34  ;;  %v2543_v34 = vpack.c.bf16 %v149_v28, %v136_v27  ;;  %v668_v26 = vld [vmem:[%s5948_s1 + $0x1418] sm:$0xff]  ;;  %v279_v27 = vld [vmem:[%s5948_s1 + $0x7f0] sm:$0xff]  ;;  %v682_v28 = vld [vmem:[%s5948_s1 + $0x1488] sm:$0xff] }
 0x179   :  { %v695_v30 = vld [vmem:[%s5948_s1 + $0x14f0] sm:$0xff] }
 0x17e   :  { %2526 = vmatpush1.bf16.xpose.msra.mxu0 %v2525_v44  ;;  %v591_v44 = vld [vmem:[%s5948_s1 + $0x11b0] sm:$0xff] }
 0x17f   :  { %2958 = vmatpush1.bf16.xpose.msra.mxu1 %v2957_v45  ;;  %2528 = vmatprep.subr.bf16.mxu0 %v2527_v46  ;;  %v2545_v45 = vpack.c.bf16 %v148_v38, %v135_v36  ;;  %v2977_v46 = vpack.c.bf16 %v564_v40, %v551_v39  ;;  %v2979_v48 = vpack.c.bf16 %v591_v44, %v578_v43  ;;  %v278_v36 = vld [vmem:[%s5948_s1 + $0x7e8] sm:$0xff]  ;;  %v681_v38 = vld [vmem:[%s5948_s1 + $0x1480] sm:$0xff]  ;;  %v292_v40 = vld [vmem:[%s5948_s1 + $0x858] sm:$0xff] }
 0x180   :  { %2960 = vmatprep.subr.bf16.mxu1 %v2959_v47  ;;  %v2547_v47 = vpack.c.bf16 %v175_v42, %v162_v41  ;;  %v694_v39 = vld [vmem:[%s5948_s1 + $0x14e8] sm:$0xff]  ;;  %v305_v41 = vld [vmem:[%s5948_s1 + $0x8c0] sm:$0xff]  ;;  %v708_v42 = vld [vmem:[%s5948_s1 + $0x1558] sm:$0xff] }
 0x181   :  { %v721_v43 = vld [vmem:[%s5948_s1 + $0x15c0] sm:$0xff] }
 0x185   :  { %1333 = vmatmul.mubr.f32.vlgmr.msra.gmra.mrb[0].mxu0 %v4104_v21 }
 0x186   :  { %2530 = vmatpush1.bf16.xpose.msra.mxu0 %v2529_v56  ;;  %1830 = vmatmul.mubr.f32.vlgmr.msra.gmra.mrb[0].mxu1 %v4104_v21  ;;  %v84_v21 = vld [vmem:[%s5948_s1 + $0x1d8] sm:$0xff]  ;;  %v2549_v56 = vpack.c.bf16 %v174_v50, %v161_v49  ;;  %v707_v50 = vld [vmem:[%s5948_s1 + $0x1550] sm:$0xff] }
 0x187   :  { %2962 = vmatpush1.bf16.xpose.msra.mxu1 %v2961_v57  ;;  %2532 = vmatprep.subr.bf16.mxu0 %v2531_v58  ;;  %v2535_v7 = vpack.c.bf16 %v97_v1, %v84_v21  ;;  %v2981_v57 = vpack.c.bf16 %v590_v29, %v577_v51  ;;  %v2551_v58 = vpack.c.bf16 %v201_v53, %v188_v52  ;;  %v227_v21 = vld [vmem:[%s5948_s1 + $0x650] sm:$0xff]  ;;  %v630_v1 = vld [vmem:[%s5948_s1 + $0x12e8] sm:$0xff]  ;;  %v304_v49 = vld [vmem:[%s5948_s1 + $0x8b8] sm:$0xff] }
 0x188   :  { %2964 = vmatprep.subr.bf16.mxu1 %v2963_v59  ;;  %1403 = vmatprep.mubr.f32.mxu0 %v894_v60  ;;  %v2983_v59 = vpack.c.bf16 %v617_v37, %v604_v54  ;;  %v720_v51 = vld [vmem:[%s5948_s1 + $0x15b8] sm:$0xff]  ;;  %v318_v29 = vld [vmem:[%s5948_s1 + $0x928] sm:$0xff]  ;;  %v331_v52 = vld [vmem:[%s5948_s1 + $0x990] sm:$0xff] }
 0x189   :  { %1900 = vmatprep.mubr.f32.mxu1 %v894_v60  ;;  %v187_v60 = vld [vmem:[%s5948_s1 + $0x510] sm:$0xff]  ;;  %v734_v53 = vld [vmem:[%s5948_s1 + $0x1628] sm:$0xff] }
 0x18a   :  { %v2553_v3 = vpack.c.bf16 %v200_v61, %v187_v60  ;;  %v747_v54 = vld [vmem:[%s5948_s1 + $0x1690] sm:$0xff]  ;;  %v330_v60 = vld [vmem:[%s5948_s1 + $0x988] sm:$0xff]  ;;  %v733_v61 = vld [vmem:[%s5948_s1 + $0x1620] sm:$0xff] }
 0x18e   :  { %2534 = vmatpush1.bf16.xpose.msra.mxu0 %v2533_v4  ;;  %v2985_v4 = vpack.c.bf16 %v616_v63, %v603_v62  ;;  %v746_v62 = vld [vmem:[%s5948_s1 + $0x1688] sm:$0xff]  ;;  %v344_v63 = vld [vmem:[%s5948_s1 + $0x9f8] sm:$0xff] }
 0x18f   :  { %2966 = vmatpush1.bf16.xpose.msra.mxu1 %v2965_v5  ;;  %2536 = vmatprep.subr.bf16.mxu0 %v2535_v7  ;;  %v2555_v5 = vpack.c.bf16 %v227_v21, %v214_v0  ;;  %v2987_v7 = vpack.c.bf16 %v643_v2, %v630_v1  ;;  %v357_v0 = vld [vmem:[%s5948_s1 + $0xa60] sm:$0xff]  ;;  %v760_v21 = vld [vmem:[%s5948_s1 + $0x16f8] sm:$0xff] }
 0x190   :  { %2968 = vmatprep.subr.bf16.mxu1 %v2967_v8  ;;  %v213_v8 = vld [vmem:[%s5948_s1 + $0x5e0] sm:$0xff] }
 0x191   :  { %v2557_v17 = vpack.c.bf16 %v226_v9, %v213_v8  ;;  %v773_v1 = vld [vmem:[%s5948_s1 + $0x1760] sm:$0xff]  ;;  %v356_v8 = vld [vmem:[%s5948_s1 + $0xa58] sm:$0xff]  ;;  %v759_v9 = vld [vmem:[%s5948_s1 + $0x16f0] sm:$0xff] }
 0x196   :  { %2538 = vmatpush1.bf16.xpose.msra.mxu0 %v2537_v18  ;;  %v2989_v18 = vpack.c.bf16 %v642_v11, %v629_v10  ;;  %v772_v10 = vld [vmem:[%s5948_s1 + $0x1758] sm:$0xff]  ;;  %v370_v11 = vld [vmem:[%s5948_s1 + $0xac8] sm:$0xff] }
 0x197   :  { %2970 = vmatpush1.bf16.xpose.msra.mxu1 %v2969_v19  ;;  %2540 = vmatprep.subr.bf16.mxu0 %v2539_v22  ;;  %v2559_v19 = vpack.c.bf16 %v253_v13, %v240_v12  ;;  %v2991_v22 = vpack.c.bf16 %v669_v16, %v656_v14  ;;  %v383_v12 = vld [vmem:[%s5948_s1 + $0xb30] sm:$0xff]  ;;  %v786_v13 = vld [vmem:[%s5948_s1 + $0x17c8] sm:$0xff] }
 0x198   :  { %2972 = vmatprep.subr.bf16.mxu1 %v2971_v23  ;;  %v239_v23 = vld [vmem:[%s5948_s1 + $0x6b0] sm:$0xff] }
 0x199   :  { %v2561_v31 = vpack.c.bf16 %v252_v24, %v239_v23  ;;  %v799_v14 = vld [vmem:[%s5948_s1 + $0x1830] sm:$0xff]  ;;  %v382_v23 = vld [vmem:[%s5948_s1 + $0xb28] sm:$0xff]  ;;  %v785_v24 = vld [vmem:[%s5948_s1 + $0x17c0] sm:$0xff] }
 0x19e   :  { %2542 = vmatpush1.bf16.xpose.msra.mxu0 %v2541_v32  ;;  %v2993_v32 = vpack.c.bf16 %v668_v26, %v655_v25  ;;  %v798_v25 = vld [vmem:[%s5948_s1 + $0x1828] sm:$0xff]  ;;  %v396_v26 = vld [vmem:[%s5948_s1 + $0xb98] sm:$0xff] }
 0x19f   :  { %2974 = vmatpush1.bf16.xpose.msra.mxu1 %v2973_v33  ;;  %2544 = vmatprep.subr.bf16.mxu0 %v2543_v34  ;;  %v2563_v33 = vpack.c.bf16 %v279_v27, %v266_v20  ;;  %v2995_v34 = vpack.c.bf16 %v695_v30, %v682_v28  ;;  %v409_v20 = vld [vmem:[%s5948_s1 + $0xc00] sm:$0xff]  ;;  %v812_v27 = vld [vmem:[%s5948_s1 + $0x1898] sm:$0xff] }
 0x1a0   :  { %2976 = vmatprep.subr.bf16.mxu1 %v2975_v35  ;;  %v265_v35 = vld [vmem:[%s5948_s1 + $0x780] sm:$0xff] }
 0x1a1   :  { %v2565_v44 = vpack.c.bf16 %v278_v36, %v265_v35  ;;  %v825_v28 = vld [vmem:[%s5948_s1 + $0x1900] sm:$0xff]  ;;  %v408_v35 = vld [vmem:[%s5948_s1 + $0xbf8] sm:$0xff]  ;;  %v811_v36 = vld [vmem:[%s5948_s1 + $0x1890] sm:$0xff] }
 0x1a6   :  { %2546 = vmatpush1.bf16.xpose.msra.mxu0 %v2545_v45  ;;  %v2997_v45 = vpack.c.bf16 %v694_v39, %v681_v38  ;;  %v824_v38 = vld [vmem:[%s5948_s1 + $0x18f8] sm:$0xff]  ;;  %v422_v39 = vld [vmem:[%s5948_s1 + $0xc68] sm:$0xff] }
 0x1a7   :  { %2978 = vmatpush1.bf16.xpose.msra.mxu1 %v2977_v46  ;;  %2548 = vmatprep.subr.bf16.mxu0 %v2547_v47  ;;  %v2567_v46 = vpack.c.bf16 %v305_v41, %v292_v40  ;;  %v2999_v47 = vpack.c.bf16 %v721_v43, %v708_v42  ;;  %v435_v40 = vld [vmem:[%s5948_s1 + $0xcd0] sm:$0xff]  ;;  %v838_v41 = vld [vmem:[%s5948_s1 + $0x1968] sm:$0xff] }
 0x1a8   :  { %2980 = vmatprep.subr.bf16.mxu1 %v2979_v48  ;;  %v291_v48 = vld [vmem:[%s5948_s1 + $0x850] sm:$0xff] }
 0x1a9   :  { %v2569_v37 = vpack.c.bf16 %v304_v49, %v291_v48  ;;  %v851_v42 = vld [vmem:[%s5948_s1 + $0x19d0] sm:$0xff]  ;;  %v434_v48 = vld [vmem:[%s5948_s1 + $0xcc8] sm:$0xff]  ;;  %v837_v49 = vld [vmem:[%s5948_s1 + $0x1960] sm:$0xff] }
 0x1ae   :  { %2550 = vmatpush1.bf16.xpose.msra.mxu0 %v2549_v56  ;;  %v3001_v56 = vpack.c.bf16 %v720_v51, %v707_v50  ;;  %v850_v50 = vld [vmem:[%s5948_s1 + $0x19c8] sm:$0xff] }
 0x1af   :  { %2982 = vmatpush1.bf16.xpose.msra.mxu1 %v2981_v57  ;;  %2552 = vmatprep.subr.bf16.mxu0 %v2551_v58  ;;  %v2571_v57 = vpack.c.bf16 %v331_v52, %v318_v29  ;;  %v3003_v58 = vpack.c.bf16 %v747_v54, %v734_v53  ;;  %v34_v51 = vld [vmem:[%s5948_s1 + $0x48] sm:$0xff]  ;;  %v47_v29 = vld [vmem:[%s5948_s1 + $0xb0] sm:$0xff] }
 0x1b0   :  { %2984 = vmatprep.subr.bf16.mxu1 %v2983_v59  ;;  %v317_v59 = vld [vmem:[%s5948_s1 + $0x920] sm:$0xff]  ;;  %v450_v52 = vld [vmem:[%s5948_s1 + $0xd48] sm:$0xff]  ;;  %v463_v53 = vld [vmem:[%s5948_s1 + $0xdb0] sm:$0xff] }
 0x1b1   :  { %v2573_v2 = vpack.c.bf16 %v330_v60, %v317_v59  ;;  %v46_v59 = vld [vmem:[%s5948_s1 + $0xa8] sm:$0xff]  ;;  %v449_v60 = vld [vmem:[%s5948_s1 + $0xd40] sm:$0xff] }
 0x1b6   :  { %2554 = vmatpush1.bf16.xpose.msra.mxu0 %v2553_v3  ;;  %v3005_v3 = vpack.c.bf16 %v746_v62, %v733_v61  ;;  %v4881_v61 = vld [vmem:[%s5947_s0 + $0x10] sm:$0xff]  ;;  %v462_v62 = vld [vmem:[%s5948_s1 + $0xda8] sm:$0xff] }
 0x1b7   :  { %2986 = vmatpush1.bf16.xpose.msra.mxu1 %v2985_v4  ;;  %2556 = vmatprep.subr.bf16.mxu0 %v2555_v5  ;;  %v2575_v4 = vpack.c.bf16 %v357_v0, %v344_v63  ;;  %v3007_v5 = vpack.c.bf16 %v773_v1, %v760_v21  ;;  %v60_v63 = vld [vmem:[%s5948_s1 + $0x118] sm:$0xff]  ;;  %v73_v0 = vld [vmem:[%s5948_s1 + $0x180] sm:$0xff]  ;;  %v4894_v21 = vrot.slane %v4881_v61, %v3433_v15 }
 0x1b8   :  { %2988 = vmatprep.subr.bf16.mxu1 %v2987_v7  ;;  %v343_v7 = vld [vmem:[%s5948_s1 + $0x9f0] sm:$0xff]  ;;  %v476_v1 = vld [vmem:[%s5948_s1 + $0xe18] sm:$0xff] }
 0x1b9   :  { %v2577_v16 = vpack.c.bf16 %v356_v8, %v343_v7  ;;  %v910_v8 = vcombine.high %v4894_v21, %v4894_v21 }
 0x1be   :  { %2558 = vmatpush1.bf16.xpose.msra.mxu0 %v2557_v17  ;;  %v3009_v17 = vpack.c.bf16 %v772_v10, %v759_v9  ;;  %v59_v9 = vld [vmem:[%s5948_s1 + $0x110] sm:$0xff]  ;;  %v72_v10 = vld [vmem:[%s5948_s1 + $0x178] sm:$0xff] }
 0x1bf   :  { %2990 = vmatpush1.bf16.xpose.msra.mxu1 %v2989_v18  ;;  %2560 = vmatprep.subr.bf16.mxu0 %v2559_v19  ;;  %v2579_v18 = vpack.c.bf16 %v383_v12, %v370_v11  ;;  %v3011_v19 = vpack.c.bf16 %v799_v14, %v786_v13  ;;  %v475_v11 = vld [vmem:[%s5948_s1 + $0xe10] sm:$0xff]  ;;  %v488_v12 = vld [vmem:[%s5948_s1 + $0xe78] sm:$0xff]  ;;  %v502_v14 = vld [vmem:[%s5948_s1 + $0xee8] sm:$0xff] }
 0x1c0   :  { %2992 = vmatprep.subr.bf16.mxu1 %v2991_v22  ;;  %v369_v22 = vld [vmem:[%s5948_s1 + $0xac0] sm:$0xff]  ;;  %v99_v13 = vld [vmem:[%s5948_s1 + $0x250] sm:$0xff] }
 0x1c1   :  { %v2581_v30 = vpack.c.bf16 %v382_v23, %v369_v22  ;;  %v85_v23 = vld [vmem:[%s5948_s1 + $0x1e0] sm:$0xff] }
 0x1c6   :  { %2562 = vmatpush1.bf16.xpose.msra.mxu0 %v2561_v31  ;;  %v3013_v31 = vpack.c.bf16 %v798_v25, %v785_v24  ;;  %v98_v24 = vld [vmem:[%s5948_s1 + $0x248] sm:$0xff]  ;;  %v501_v25 = vld [vmem:[%s5948_s1 + $0xee0] sm:$0xff] }
 0x1c7   :  { %2994 = vmatpush1.bf16.xpose.msra.mxu1 %v2993_v32  ;;  %2564 = vmatprep.subr.bf16.mxu0 %v2563_v33  ;;  %v2583_v32 = vpack.c.bf16 %v409_v20, %v396_v26  ;;  %v3015_v33 = vpack.c.bf16 %v825_v28, %v812_v27  ;;  %v514_v26 = vld [vmem:[%s5948_s1 + $0xf48] sm:$0xff]  ;;  %v112_v20 = vld [vmem:[%s5948_s1 + $0x2b8] sm:$0xff]  ;;  %v125_v27 = vld [vmem:[%s5948_s1 + $0x320] sm:$0xff] }
 0x1c8   :  { %2996 = vmatprep.subr.bf16.mxu1 %v2995_v34  ;;  %v395_v34 = vld [vmem:[%s5948_s1 + $0xb90] sm:$0xff]  ;;  %v528_v28 = vld [vmem:[%s5948_s1 + $0xfb8] sm:$0xff] }
 0x1c9   :  { %v2585_v43 = vpack.c.bf16 %v408_v35, %v395_v34  ;;  %v111_v35 = vld [vmem:[%s5948_s1 + $0x2b0] sm:$0xff] }
 0x1ce   :  { %2566 = vmatpush1.bf16.xpose.msra.mxu0 %v2565_v44  ;;  %v3017_v44 = vpack.c.bf16 %v824_v38, %v811_v36  ;;  %v124_v36 = vld [vmem:[%s5948_s1 + $0x318] sm:$0xff]  ;;  %v527_v38 = vld [vmem:[%s5948_s1 + $0xfb0] sm:$0xff] }
 0x1cf   :  { %2998 = vmatpush1.bf16.xpose.msra.mxu1 %v2997_v45  ;;  %2568 = vmatprep.subr.bf16.mxu0 %v2567_v46  ;;  %v2587_v45 = vpack.c.bf16 %v435_v40, %v422_v39  ;;  %v3019_v46 = vpack.c.bf16 %v851_v42, %v838_v41  ;;  %v540_v39 = vld [vmem:[%s5948_s1 + $0x1018] sm:$0xff]  ;;  %v138_v40 = vld [vmem:[%s5948_s1 + $0x388] sm:$0xff]  ;;  %v151_v41 = vld [vmem:[%s5948_s1 + $0x3f0] sm:$0xff] }
 0x1d0   :  { %3000 = vmatprep.subr.bf16.mxu1 %v2999_v47  ;;  %v421_v47 = vld [vmem:[%s5948_s1 + $0xc60] sm:$0xff]  ;;  %v554_v42 = vld [vmem:[%s5948_s1 + $0x1088] sm:$0xff] }
 0x1d1   :  { %v2589_v54 = vpack.c.bf16 %v434_v48, %v421_v47  ;;  %v137_v48 = vld [vmem:[%s5948_s1 + $0x380] sm:$0xff] }
 0x1d6   :  { %2570 = vmatpush1.bf16.xpose.msra.mxu0 %v2569_v37  ;;  %v3021_v37 = vpack.c.bf16 %v850_v50, %v837_v49  ;;  %v150_v49 = vld [vmem:[%s5948_s1 + $0x3e8] sm:$0xff]  ;;  %v553_v50 = vld [vmem:[%s5948_s1 + $0x1080] sm:$0xff] }
 0x1d7   :  { %3002 = vmatpush1.bf16.xpose.msra.mxu1 %v3001_v56  ;;  %2572 = vmatprep.subr.bf16.mxu0 %v2571_v57  ;;  %v2591_v56 = vpack.c.bf16 %v47_v29, %v34_v51  ;;  %v3023_v57 = vpack.c.bf16 %v463_v53, %v450_v52  ;;  %v566_v51 = vld [vmem:[%s5948_s1 + $0x10e8] sm:$0xff]  ;;  %v164_v29 = vld [vmem:[%s5948_s1 + $0x458] sm:$0xff]  ;;  %v177_v52 = vld [vmem:[%s5948_s1 + $0x4c0] sm:$0xff] }
 0x1d8   :  { %3004 = vmatprep.subr.bf16.mxu1 %v3003_v58  ;;  %v33_v58 = vld [vmem:[%s5948_s1 + $0x40] sm:$0xff]  ;;  %v580_v53 = vld [vmem:[%s5948_s1 + $0x1158] sm:$0xff] }
 0x1de   :  { %2574 = vmatpush1.bf16.xpose.msra.mxu0 %v2573_v2  ;;  %v489_v2 = vld [vmem:[%s5948_s1 + $0xe80] sm:$0xff] }
 0x1df   :  { %3006 = vmatpush1.bf16.xpose.msra.mxu1 %v3005_v3  ;;  %2576 = vmatprep.subr.bf16.mxu0 %v2575_v4  ;;  %v2593_v3 = vpack.c.bf16 %v46_v59, %v33_v58  ;;  %v3025_v4 = vpack.c.bf16 %v462_v62, %v449_v60  ;;  %v3027_v7 = vpack.c.bf16 %v489_v2, %v476_v1  ;;  %v163_v59 = vld [vmem:[%s5948_s1 + $0x450] sm:$0xff]  ;;  %v176_v60 = vld [vmem:[%s5948_s1 + $0x4b8] sm:$0xff]  ;;  %v606_v2 = vld [vmem:[%s5948_s1 + $0x1228] sm:$0xff] }
 0x1e0   :  { %3008 = vmatprep.subr.bf16.mxu1 %v3007_v5  ;;  %v2595_v5 = vpack.c.bf16 %v73_v0, %v60_v63  ;;  %v579_v62 = vld [vmem:[%s5948_s1 + $0x1150] sm:$0xff]  ;;  %v592_v63 = vld [vmem:[%s5948_s1 + $0x11b8] sm:$0xff]  ;;  %v190_v0 = vld [vmem:[%s5948_s1 + $0x528] sm:$0xff] }
 0x1e1   :  { %v203_v1 = vld [vmem:[%s5948_s1 + $0x590] sm:$0xff] }
 0x1e6   :  { %2578 = vmatpush1.bf16.xpose.msra.mxu0 %v2577_v16  ;;  %v515_v16 = vld [vmem:[%s5948_s1 + $0xf50] sm:$0xff] }
 0x1e7   :  { %3010 = vmatpush1.bf16.xpose.msra.mxu1 %v3009_v17  ;;  %2580 = vmatprep.subr.bf16.mxu0 %v2579_v18  ;;  %v2597_v17 = vpack.c.bf16 %v72_v10, %v59_v9  ;;  %v3029_v18 = vpack.c.bf16 %v488_v12, %v475_v11  ;;  %v3031_v22 = vpack.c.bf16 %v515_v16, %v502_v14  ;;  %v189_v9 = vld [vmem:[%s5948_s1 + $0x520] sm:$0xff]  ;;  %v202_v10 = vld [vmem:[%s5948_s1 + $0x588] sm:$0xff]  ;;  %v632_v14 = vld [vmem:[%s5948_s1 + $0x12f8] sm:$0xff] }
 0x1e8   :  { %3012 = vmatprep.subr.bf16.mxu1 %v3011_v19  ;;  %v605_v11 = vld [vmem:[%s5948_s1 + $0x1220] sm:$0xff]  ;;  %v618_v12 = vld [vmem:[%s5948_s1 + $0x1288] sm:$0xff] }
 0x1e9   :  { %v645_v16 = vld [vmem:[%s5948_s1 + $0x1360] sm:$0xff] }
 0x1ee   :  { %2582 = vmatpush1.bf16.xpose.msra.mxu0 %v2581_v30  ;;  %v541_v30 = vld [vmem:[%s5948_s1 + $0x1020] sm:$0xff] }
 0x1ef   :  { %3014 = vmatpush1.bf16.xpose.msra.mxu1 %v3013_v31  ;;  %2584 = vmatprep.subr.bf16.mxu0 %v2583_v32  ;;  %v2601_v31 = vpack.c.bf16 %v98_v24, %v85_v23  ;;  %v3033_v32 = vpack.c.bf16 %v514_v26, %v501_v25  ;;  %v3035_v34 = vpack.c.bf16 %v541_v30, %v528_v28  ;;  %v215_v23 = vld [vmem:[%s5948_s1 + $0x5f0] sm:$0xff]  ;;  %v228_v24 = vld [vmem:[%s5948_s1 + $0x658] sm:$0xff]  ;;  %v658_v28 = vld [vmem:[%s5948_s1 + $0x13c8] sm:$0xff] }
 0x1f0   :  { %3016 = vmatprep.subr.bf16.mxu1 %v3015_v33  ;;  %v2603_v33 = vpack.c.bf16 %v125_v27, %v112_v20  ;;  %v631_v25 = vld [vmem:[%s5948_s1 + $0x12f0] sm:$0xff]  ;;  %v644_v26 = vld [vmem:[%s5948_s1 + $0x1358] sm:$0xff]  ;;  %v242_v20 = vld [vmem:[%s5948_s1 + $0x6c8] sm:$0xff] }
 0x1f1   :  { %v255_v27 = vld [vmem:[%s5948_s1 + $0x730] sm:$0xff] }
 0x1f2   :  { %v671_v30 = vld [vmem:[%s5948_s1 + $0x1430] sm:$0xff] }
 0x1f6   :  { %2586 = vmatpush1.bf16.xpose.msra.mxu0 %v2585_v43  ;;  %v567_v43 = vld [vmem:[%s5948_s1 + $0x10f0] sm:$0xff] }
 0x1f7   :  { %3018 = vmatpush1.bf16.xpose.msra.mxu1 %v3017_v44  ;;  %2588 = vmatprep.subr.bf16.mxu0 %v2587_v45  ;;  %v2605_v44 = vpack.c.bf16 %v124_v36, %v111_v35  ;;  %v3037_v45 = vpack.c.bf16 %v540_v39, %v527_v38  ;;  %v3039_v47 = vpack.c.bf16 %v567_v43, %v554_v42  ;;  %v241_v35 = vld [vmem:[%s5948_s1 + $0x6c0] sm:$0xff]  ;;  %v254_v36 = vld [vmem:[%s5948_s1 + $0x728] sm:$0xff]  ;;  %v684_v42 = vld [vmem:[%s5948_s1 + $0x1498] sm:$0xff] }
 0x1f8   :  { %3020 = vmatprep.subr.bf16.mxu1 %v3019_v46  ;;  %v2607_v46 = vpack.c.bf16 %v151_v41, %v138_v40  ;;  %v657_v38 = vld [vmem:[%s5948_s1 + $0x13c0] sm:$0xff]  ;;  %v670_v39 = vld [vmem:[%s5948_s1 + $0x1428] sm:$0xff]  ;;  %v268_v40 = vld [vmem:[%s5948_s1 + $0x798] sm:$0xff] }
 0x1f9   :  { %v281_v41 = vld [vmem:[%s5948_s1 + $0x800] sm:$0xff] }
 0x1fa   :  { %v697_v43 = vld [vmem:[%s5948_s1 + $0x1500] sm:$0xff] }
 0x1fe   :  { %2590 = vmatpush1.bf16.xpose.msra.mxu0 %v2589_v54  ;;  %v593_v54 = vld [vmem:[%s5948_s1 + $0x11c0] sm:$0xff] }
 0x1ff   :  { %3022 = vmatpush1.bf16.xpose.msra.mxu1 %v3021_v37  ;;  %2592 = vmatprep.subr.bf16.mxu0 %v2591_v56  ;;  %v2609_v37 = vpack.c.bf16 %v150_v49, %v137_v48  ;;  %v3041_v56 = vpack.c.bf16 %v566_v51, %v553_v50  ;;  %v3043_v58 = vpack.c.bf16 %v593_v54, %v580_v53  ;;  %v267_v48 = vld [vmem:[%s5948_s1 + $0x790] sm:$0xff]  ;;  %v280_v49 = vld [vmem:[%s5948_s1 + $0x7f8] sm:$0xff]  ;;  %v710_v53 = vld [vmem:[%s5948_s1 + $0x1568] sm:$0xff] }
 0x200   :  { %3024 = vmatprep.subr.bf16.mxu1 %v3023_v57  ;;  %v2611_v57 = vpack.c.bf16 %v177_v52, %v164_v29  ;;  %v683_v50 = vld [vmem:[%s5948_s1 + $0x1490] sm:$0xff]  ;;  %v696_v51 = vld [vmem:[%s5948_s1 + $0x14f8] sm:$0xff]  ;;  %v294_v29 = vld [vmem:[%s5948_s1 + $0x868] sm:$0xff] }
 0x201   :  { %v307_v52 = vld [vmem:[%s5948_s1 + $0x8d0] sm:$0xff] }
 0x202   :  { %v723_v54 = vld [vmem:[%s5948_s1 + $0x15d0] sm:$0xff] }
 0x205   :  { %1404 = vmatmul.mubr.f32.vlgmr.msra.gmra.mrb[0].mxu0 %v4503_v55 }
 0x206   :  { %2594 = vmatpush1.bf16.xpose.msra.mxu0 %v2593_v3  ;;  %1901 = vmatmul.mubr.f32.vlgmr.msra.gmra.mrb[0].mxu1 %v4503_v55  ;;  %v86_v55 = vld [vmem:[%s5948_s1 + $0x1e8] sm:$0xff]  ;;  %v619_v3 = vld [vmem:[%s5948_s1 + $0x1290] sm:$0xff] }
 0x207   :  { %3026 = vmatpush1.bf16.xpose.msra.mxu1 %v3025_v4  ;;  %2596 = vmatprep.subr.bf16.mxu0 %v2595_v5  ;;  %v2599_v19 = vpack.c.bf16 %v99_v13, %v86_v55  ;;  %v2613_v4 = vpack.c.bf16 %v176_v60, %v163_v59  ;;  %v3045_v5 = vpack.c.bf16 %v592_v63, %v579_v62  ;;  %v216_v55 = vld [vmem:[%s5948_s1 + $0x5f8] sm:$0xff]  ;;  %v229_v13 = vld [vmem:[%s5948_s1 + $0x660] sm:$0xff]  ;;  %v306_v60 = vld [vmem:[%s5948_s1 + $0x8c8] sm:$0xff] }
 0x208   :  { %3028 = vmatprep.subr.bf16.mxu1 %v3027_v7  ;;  %1474 = vmatprep.mubr.f32.mxu0 %v910_v8  ;;  %v2615_v7 = vpack.c.bf16 %v203_v1, %v190_v0  ;;  %v293_v59 = vld [vmem:[%s5948_s1 + $0x860] sm:$0xff]  ;;  %v722_v63 = vld [vmem:[%s5948_s1 + $0x15c8] sm:$0xff]  ;;  %v320_v0 = vld [vmem:[%s5948_s1 + $0x938] sm:$0xff] }
 0x209   :  { %1971 = vmatprep.mubr.f32.mxu1 %v910_v8  ;;  %v3047_v8 = vpack.c.bf16 %v619_v3, %v606_v2  ;;  %v709_v62 = vld [vmem:[%s5948_s1 + $0x1560] sm:$0xff]  ;;  %v736_v2 = vld [vmem:[%s5948_s1 + $0x1638] sm:$0xff] }
 0x20a   :  { %v333_v1 = vld [vmem:[%s5948_s1 + $0x9a0] sm:$0xff] }
 0x20b   :  { %v749_v3 = vld [vmem:[%s5948_s1 + $0x16a0] sm:$0xff] }
 0x20e   :  { %2598 = vmatpush1.bf16.xpose.msra.mxu0 %v2597_v17  ;;  %v2617_v17 = vpack.c.bf16 %v202_v10, %v189_v9  ;;  %v319_v9 = vld [vmem:[%s5948_s1 + $0x930] sm:$0xff]  ;;  %v332_v10 = vld [vmem:[%s5948_s1 + $0x998] sm:$0xff] }
 0x20f   :  { %3030 = vmatpush1.bf16.xpose.msra.mxu1 %v3029_v18  ;;  %2600 = vmatprep.subr.bf16.mxu0 %v2599_v19  ;;  %v3049_v18 = vpack.c.bf16 %v618_v12, %v605_v11  ;;  %v2619_v19 = vpack.c.bf16 %v229_v13, %v216_v55  ;;  %v735_v11 = vld [vmem:[%s5948_s1 + $0x1630] sm:$0xff]  ;;  %v748_v12 = vld [vmem:[%s5948_s1 + $0x1698] sm:$0xff]  ;;  %v346_v55 = vld [vmem:[%s5948_s1 + $0xa08] sm:$0xff] }
 0x210   :  { %3032 = vmatprep.subr.bf16.mxu1 %v3031_v22  ;;  %v3051_v22 = vpack.c.bf16 %v645_v16, %v632_v14  ;;  %v359_v13 = vld [vmem:[%s5948_s1 + $0xa70] sm:$0xff]  ;;  %v762_v14 = vld [vmem:[%s5948_s1 + $0x1708] sm:$0xff] }
 0x211   :  { %v775_v16 = vld [vmem:[%s5948_s1 + $0x1770] sm:$0xff] }
 0x216   :  { %2602 = vmatpush1.bf16.xpose.msra.mxu0 %v2601_v31  ;;  %v2621_v31 = vpack.c.bf16 %v228_v24, %v215_v23  ;;  %v345_v23 = vld [vmem:[%s5948_s1 + $0xa00] sm:$0xff]  ;;  %v358_v24 = vld [vmem:[%s5948_s1 + $0xa68] sm:$0xff] }
 0x217   :  { %3034 = vmatpush1.bf16.xpose.msra.mxu1 %v3033_v32  ;;  %2604 = vmatprep.subr.bf16.mxu0 %v2603_v33  ;;  %v3053_v32 = vpack.c.bf16 %v644_v26, %v631_v25  ;;  %v2623_v33 = vpack.c.bf16 %v255_v27, %v242_v20  ;;  %v761_v25 = vld [vmem:[%s5948_s1 + $0x1700] sm:$0xff]  ;;  %v774_v26 = vld [vmem:[%s5948_s1 + $0x1768] sm:$0xff]  ;;  %v372_v20 = vld [vmem:[%s5948_s1 + $0xad8] sm:$0xff] }
 0x218   :  { %3036 = vmatprep.subr.bf16.mxu1 %v3035_v34  ;;  %v3055_v34 = vpack.c.bf16 %v671_v30, %v658_v28  ;;  %v385_v27 = vld [vmem:[%s5948_s1 + $0xb40] sm:$0xff]  ;;  %v788_v28 = vld [vmem:[%s5948_s1 + $0x17d8] sm:$0xff] }
 0x219   :  { %v801_v30 = vld [vmem:[%s5948_s1 + $0x1840] sm:$0xff] }
 0x21e   :  { %2606 = vmatpush1.bf16.xpose.msra.mxu0 %v2605_v44  ;;  %v2625_v44 = vpack.c.bf16 %v254_v36, %v241_v35  ;;  %v371_v35 = vld [vmem:[%s5948_s1 + $0xad0] sm:$0xff]  ;;  %v384_v36 = vld [vmem:[%s5948_s1 + $0xb38] sm:$0xff] }
 0x21f   :  { %3038 = vmatpush1.bf16.xpose.msra.mxu1 %v3037_v45  ;;  %2608 = vmatprep.subr.bf16.mxu0 %v2607_v46  ;;  %v3057_v45 = vpack.c.bf16 %v670_v39, %v657_v38  ;;  %v2627_v46 = vpack.c.bf16 %v281_v41, %v268_v40  ;;  %v787_v38 = vld [vmem:[%s5948_s1 + $0x17d0] sm:$0xff]  ;;  %v800_v39 = vld [vmem:[%s5948_s1 + $0x1838] sm:$0xff]  ;;  %v398_v40 = vld [vmem:[%s5948_s1 + $0xba8] sm:$0xff] }
 0x220   :  { %3040 = vmatprep.subr.bf16.mxu1 %v3039_v47  ;;  %v3059_v47 = vpack.c.bf16 %v697_v43, %v684_v42  ;;  %v411_v41 = vld [vmem:[%s5948_s1 + $0xc10] sm:$0xff]  ;;  %v814_v42 = vld [vmem:[%s5948_s1 + $0x18a8] sm:$0xff] }
 0x221   :  { %v827_v43 = vld [vmem:[%s5948_s1 + $0x1910] sm:$0xff] }
 0x226   :  { %2610 = vmatpush1.bf16.xpose.msra.mxu0 %v2609_v37  ;;  %v2629_v37 = vpack.c.bf16 %v280_v49, %v267_v48  ;;  %v397_v48 = vld [vmem:[%s5948_s1 + $0xba0] sm:$0xff]  ;;  %v410_v49 = vld [vmem:[%s5948_s1 + $0xc08] sm:$0xff] }
 0x227   :  { %3042 = vmatpush1.bf16.xpose.msra.mxu1 %v3041_v56  ;;  %2612 = vmatprep.subr.bf16.mxu0 %v2611_v57  ;;  %v3061_v56 = vpack.c.bf16 %v696_v51, %v683_v50  ;;  %v2631_v57 = vpack.c.bf16 %v307_v52, %v294_v29  ;;  %v813_v50 = vld [vmem:[%s5948_s1 + $0x18a0] sm:$0xff]  ;;  %v826_v51 = vld [vmem:[%s5948_s1 + $0x1908] sm:$0xff]  ;;  %v424_v29 = vld [vmem:[%s5948_s1 + $0xc78] sm:$0xff] }
 0x228   :  { %3044 = vmatprep.subr.bf16.mxu1 %v3043_v58  ;;  %v3063_v58 = vpack.c.bf16 %v723_v54, %v710_v53  ;;  %v437_v52 = vld [vmem:[%s5948_s1 + $0xce0] sm:$0xff]  ;;  %v840_v53 = vld [vmem:[%s5948_s1 + $0x1978] sm:$0xff] }
 0x229   :  { %v853_v54 = vld [vmem:[%s5948_s1 + $0x19e0] sm:$0xff] }
 0x22e   :  { %2614 = vmatpush1.bf16.xpose.msra.mxu0 %v2613_v4  ;;  %v2633_v4 = vpack.c.bf16 %v306_v60, %v293_v59  ;;  %v423_v59 = vld [vmem:[%s5948_s1 + $0xc70] sm:$0xff]  ;;  %v436_v60 = vld [vmem:[%s5948_s1 + $0xcd8] sm:$0xff] }
 0x22f   :  { %3046 = vmatpush1.bf16.xpose.msra.mxu1 %v3045_v5  ;;  %2616 = vmatprep.subr.bf16.mxu0 %v2615_v7  ;;  %v3065_v5 = vpack.c.bf16 %v722_v63, %v709_v62  ;;  %v2635_v7 = vpack.c.bf16 %v333_v1, %v320_v0  ;;  %v839_v62 = vld [vmem:[%s5948_s1 + $0x1970] sm:$0xff]  ;;  %v852_v63 = vld [vmem:[%s5948_s1 + $0x19d8] sm:$0xff]  ;;  %v49_v1 = vld [vmem:[%s5948_s1 + $0xc0] sm:$0xff] }
 0x230   :  { %3048 = vmatprep.subr.bf16.mxu1 %v3047_v8  ;;  %v3067_v8 = vpack.c.bf16 %v749_v3, %v736_v2  ;;  %v36_v0 = vld [vmem:[%s5948_s1 + $0x58] sm:$0xff]  ;;  %v465_v3 = vld [vmem:[%s5948_s1 + $0xdc0] sm:$0xff] }
 0x231   :  { %v452_v2 = vld [vmem:[%s5948_s1 + $0xd58] sm:$0xff] }
 0x236   :  { %2618 = vmatpush1.bf16.xpose.msra.mxu0 %v2617_v17  ;;  %v2637_v17 = vpack.c.bf16 %v332_v10, %v319_v9  ;;  %v35_v9 = vld [vmem:[%s5948_s1 + $0x50] sm:$0xff]  ;;  %v48_v10 = vld [vmem:[%s5948_s1 + $0xb8] sm:$0xff] }
 0x237   :  { %3050 = vmatpush1.bf16.xpose.msra.mxu1 %v3049_v18  ;;  %2620 = vmatprep.subr.bf16.mxu0 %v2619_v19  ;;  %v3069_v18 = vpack.c.bf16 %v748_v12, %v735_v11  ;;  %v2639_v19 = vpack.c.bf16 %v359_v13, %v346_v55  ;;  %v451_v11 = vld [vmem:[%s5948_s1 + $0xd50] sm:$0xff]  ;;  %v895_v12 = vcombine.high %v4881_v61, %v4881_v61  ;;  %v464_v55 = vld [vmem:[%s5948_s1 + $0xdb8] sm:$0xff]  ;;  %v62_v13 = vld [vmem:[%s5948_s1 + $0x128] sm:$0xff] }
 0x238   :  { %3052 = vmatprep.subr.bf16.mxu1 %v3051_v22  ;;  %v3071_v22 = vpack.c.bf16 %v775_v16, %v762_v14  ;;  %v75_v14 = vld [vmem:[%s5948_s1 + $0x190] sm:$0xff]  ;;  %v478_v16 = vld [vmem:[%s5948_s1 + $0xe28] sm:$0xff] }
 0x239   :  { %v491_v61 = vld [vmem:[%s5948_s1 + $0xe90] sm:$0xff] }
 0x23e   :  { %2622 = vmatpush1.bf16.xpose.msra.mxu0 %v2621_v31  ;;  %v2641_v31 = vpack.c.bf16 %v358_v24, %v345_v23  ;;  %v3091_v23 = vpack.c.bf16 %v491_v61, %v478_v16  ;;  %v608_v16 = vld [vmem:[%s5948_s1 + $0x1238] sm:$0xff]  ;;  %v621_v61 = vld [vmem:[%s5948_s1 + $0x12a0] sm:$0xff] }
 0x23f   :  { %3054 = vmatpush1.bf16.xpose.msra.mxu1 %v3053_v32  ;;  %2624 = vmatprep.subr.bf16.mxu0 %v2623_v33  ;;  %v3073_v32 = vpack.c.bf16 %v774_v26, %v761_v25  ;;  %v2643_v33 = vpack.c.bf16 %v385_v27, %v372_v20  ;;  %v61_v25 = vld [vmem:[%s5948_s1 + $0x120] sm:$0xff]  ;;  %v74_v26 = vld [vmem:[%s5948_s1 + $0x188] sm:$0xff] }
 0x240   :  { %3056 = vmatprep.subr.bf16.mxu1 %v3055_v34  ;;  %v3075_v34 = vpack.c.bf16 %v801_v30, %v788_v28  ;;  %v477_v20 = vld [vmem:[%s5948_s1 + $0xe20] sm:$0xff]  ;;  %v490_v27 = vld [vmem:[%s5948_s1 + $0xe88] sm:$0xff]  ;;  %v504_v30 = vld [vmem:[%s5948_s1 + $0xef8] sm:$0xff] }
 0x241   :  { %v101_v28 = vld [vmem:[%s5948_s1 + $0x260] sm:$0xff] }
 0x246   :  { %2626 = vmatpush1.bf16.xpose.msra.mxu0 %v2625_v44  ;;  %v2645_v44 = vpack.c.bf16 %v384_v36, %v371_v35  ;;  %v87_v36 = vld [vmem:[%s5948_s1 + $0x1f0] sm:$0xff] }
 0x247   :  { %3058 = vmatpush1.bf16.xpose.msra.mxu1 %v3057_v45  ;;  %2628 = vmatprep.subr.bf16.mxu0 %v2627_v46  ;;  %v3077_v45 = vpack.c.bf16 %v800_v39, %v787_v38  ;;  %v2647_v46 = vpack.c.bf16 %v411_v41, %v398_v40  ;;  %v100_v38 = vld [vmem:[%s5948_s1 + $0x258] sm:$0xff]  ;;  %v503_v39 = vld [vmem:[%s5948_s1 + $0xef0] sm:$0xff]  ;;  %v114_v41 = vld [vmem:[%s5948_s1 + $0x2c8] sm:$0xff] }
 0x248   :  { %3060 = vmatprep.subr.bf16.mxu1 %v3059_v47  ;;  %v3079_v47 = vpack.c.bf16 %v827_v43, %v814_v42  ;;  %v516_v40 = vld [vmem:[%s5948_s1 + $0xf58] sm:$0xff]  ;;  %v127_v42 = vld [vmem:[%s5948_s1 + $0x330] sm:$0xff]  ;;  %v530_v43 = vld [vmem:[%s5948_s1 + $0xfc8] sm:$0xff] }
 0x24e   :  { %2630 = vmatpush1.bf16.xpose.msra.mxu0 %v2629_v37  ;;  %v2649_v37 = vpack.c.bf16 %v410_v49, %v397_v48  ;;  %v113_v49 = vld [vmem:[%s5948_s1 + $0x2c0] sm:$0xff] }
 0x24f   :  { %3062 = vmatpush1.bf16.xpose.msra.mxu1 %v3061_v56  ;;  %2632 = vmatprep.subr.bf16.mxu0 %v2631_v57  ;;  %v3081_v56 = vpack.c.bf16 %v826_v51, %v813_v50  ;;  %v2651_v57 = vpack.c.bf16 %v437_v52, %v424_v29  ;;  %v126_v50 = vld [vmem:[%s5948_s1 + $0x328] sm:$0xff]  ;;  %v529_v51 = vld [vmem:[%s5948_s1 + $0xfc0] sm:$0xff]  ;;  %v140_v52 = vld [vmem:[%s5948_s1 + $0x398] sm:$0xff] }
 0x250   :  { %3064 = vmatprep.subr.bf16.mxu1 %v3063_v58  ;;  %v3083_v58 = vpack.c.bf16 %v853_v54, %v840_v53  ;;  %v542_v29 = vld [vmem:[%s5948_s1 + $0x1028] sm:$0xff]  ;;  %v153_v53 = vld [vmem:[%s5948_s1 + $0x400] sm:$0xff]  ;;  %v556_v54 = vld [vmem:[%s5948_s1 + $0x1098] sm:$0xff] }
 0x256   :  { %2634 = vmatpush1.bf16.xpose.msra.mxu0 %v2633_v4  ;;  %v2653_v4 = vpack.c.bf16 %v436_v60, %v423_v59  ;;  %v139_v60 = vld [vmem:[%s5948_s1 + $0x390] sm:$0xff] }
 0x257   :  { %3066 = vmatpush1.bf16.xpose.msra.mxu1 %v3065_v5  ;;  %2636 = vmatprep.subr.bf16.mxu0 %v2635_v7  ;;  %v3085_v5 = vpack.c.bf16 %v852_v63, %v839_v62  ;;  %v2655_v7 = vpack.c.bf16 %v49_v1, %v36_v0  ;;  %v152_v62 = vld [vmem:[%s5948_s1 + $0x3f8] sm:$0xff]  ;;  %v555_v63 = vld [vmem:[%s5948_s1 + $0x1090] sm:$0xff]  ;;  %v166_v1 = vld [vmem:[%s5948_s1 + $0x468] sm:$0xff] }
 0x258   :  { %3068 = vmatprep.subr.bf16.mxu1 %v3067_v8  ;;  %v3087_v8 = vpack.c.bf16 %v465_v3, %v452_v2  ;;  %v568_v0 = vld [vmem:[%s5948_s1 + $0x10f8] sm:$0xff]  ;;  %v179_v2 = vld [vmem:[%s5948_s1 + $0x4d0] sm:$0xff]  ;;  %v582_v3 = vld [vmem:[%s5948_s1 + $0x1168] sm:$0xff] }
 0x25e   :  { %2638 = vmatpush1.bf16.xpose.msra.mxu0 %v2637_v17  ;;  %v5293_v17 = vrot.slane %v895_v12, %v3433_v15  ;;  %v581_v12 = vld [vmem:[%s5948_s1 + $0x1160] sm:$0xff] }
 0x25f   :  { %3070 = vmatpush1.bf16.xpose.msra.mxu1 %v3069_v18  ;;  %2640 = vmatprep.subr.bf16.mxu0 %v2639_v19  ;;  %v2657_v18 = vpack.c.bf16 %v48_v10, %v35_v9  ;;  %v3089_v19 = vpack.c.bf16 %v464_v55, %v451_v11  ;;  %v165_v10 = vld [vmem:[%s5948_s1 + $0x460] sm:$0xff]  ;;  %v178_v11 = vld [vmem:[%s5948_s1 + $0x4c8] sm:$0xff] }
 0x260   :  { %3072 = vmatprep.subr.bf16.mxu1 %v3071_v22  ;;  %v2659_v22 = vpack.c.bf16 %v75_v14, %v62_v13  ;;  %v911_v24 = vcombine.high %v5293_v17, %v5293_v17  ;;  %v594_v55 = vld [vmem:[%s5948_s1 + $0x11c8] sm:$0xff]  ;;  %v192_v13 = vld [vmem:[%s5948_s1 + $0x538] sm:$0xff]  ;;  %v205_v14 = vld [vmem:[%s5948_s1 + $0x5a0] sm:$0xff] }
 0x266   :  { %2642 = vmatpush1.bf16.xpose.msra.mxu0 %v2641_v31  ;;  %v517_v31 = vld [vmem:[%s5948_s1 + $0xf60] sm:$0xff] }
 0x267   :  { %3074 = vmatpush1.bf16.xpose.msra.mxu1 %v3073_v32  ;;  %2644 = vmatprep.subr.bf16.mxu0 %v2643_v33  ;;  %v2661_v32 = vpack.c.bf16 %v74_v26, %v61_v25  ;;  %v3093_v33 = vpack.c.bf16 %v490_v27, %v477_v20  ;;  %v3095_v35 = vpack.c.bf16 %v517_v31, %v504_v30  ;;  %v204_v25 = vld [vmem:[%s5948_s1 + $0x598] sm:$0xff]  ;;  %v607_v26 = vld [vmem:[%s5948_s1 + $0x1230] sm:$0xff]  ;;  %v218_v27 = vld [vmem:[%s5948_s1 + $0x608] sm:$0xff] }
 0x268   :  { %3076 = vmatprep.subr.bf16.mxu1 %v3075_v34  ;;  %v620_v20 = vld [vmem:[%s5948_s1 + $0x1298] sm:$0xff]  ;;  %v647_v30 = vld [vmem:[%s5948_s1 + $0x1370] sm:$0xff] }
 0x26e   :  { %2646 = vmatpush1.bf16.xpose.msra.mxu0 %v2645_v44  ;;  %v543_v44 = vld [vmem:[%s5948_s1 + $0x1030] sm:$0xff] }
 0x26f   :  { %3078 = vmatpush1.bf16.xpose.msra.mxu1 %v3077_v45  ;;  %2648 = vmatprep.subr.bf16.mxu0 %v2647_v46  ;;  %v2665_v45 = vpack.c.bf16 %v100_v38, %v87_v36  ;;  %v3097_v46 = vpack.c.bf16 %v516_v40, %v503_v39  ;;  %v3099_v48 = vpack.c.bf16 %v543_v44, %v530_v43  ;;  %v230_v36 = vld [vmem:[%s5948_s1 + $0x668] sm:$0xff]  ;;  %v633_v38 = vld [vmem:[%s5948_s1 + $0x1300] sm:$0xff]  ;;  %v244_v40 = vld [vmem:[%s5948_s1 + $0x6d8] sm:$0xff] }
 0x270   :  { %3080 = vmatprep.subr.bf16.mxu1 %v3079_v47  ;;  %v2667_v47 = vpack.c.bf16 %v127_v42, %v114_v41  ;;  %v646_v39 = vld [vmem:[%s5948_s1 + $0x1368] sm:$0xff]  ;;  %v257_v41 = vld [vmem:[%s5948_s1 + $0x740] sm:$0xff]  ;;  %v660_v42 = vld [vmem:[%s5948_s1 + $0x13d8] sm:$0xff] }
 0x271   :  { %v673_v43 = vld [vmem:[%s5948_s1 + $0x1440] sm:$0xff] }
 0x276   :  { %2650 = vmatpush1.bf16.xpose.msra.mxu0 %v2649_v37  ;;  %v569_v37 = vld [vmem:[%s5948_s1 + $0x1100] sm:$0xff] }
 0x277   :  { %3082 = vmatpush1.bf16.xpose.msra.mxu1 %v3081_v56  ;;  %2652 = vmatprep.subr.bf16.mxu0 %v2651_v57  ;;  %v2669_v56 = vpack.c.bf16 %v126_v50, %v113_v49  ;;  %v3101_v57 = vpack.c.bf16 %v542_v29, %v529_v51  ;;  %v3103_v59 = vpack.c.bf16 %v569_v37, %v556_v54  ;;  %v256_v49 = vld [vmem:[%s5948_s1 + $0x738] sm:$0xff]  ;;  %v659_v50 = vld [vmem:[%s5948_s1 + $0x13d0] sm:$0xff]  ;;  %v270_v29 = vld [vmem:[%s5948_s1 + $0x7a8] sm:$0xff] }
 0x278   :  { %3084 = vmatprep.subr.bf16.mxu1 %v3083_v58  ;;  %v2671_v58 = vpack.c.bf16 %v153_v53, %v140_v52  ;;  %v672_v51 = vld [vmem:[%s5948_s1 + $0x1438] sm:$0xff]  ;;  %v283_v52 = vld [vmem:[%s5948_s1 + $0x810] sm:$0xff]  ;;  %v686_v53 = vld [vmem:[%s5948_s1 + $0x14a8] sm:$0xff] }
 0x279   :  { %v699_v54 = vld [vmem:[%s5948_s1 + $0x1510] sm:$0xff] }
 0x27e   :  { %2654 = vmatpush1.bf16.xpose.msra.mxu0 %v2653_v4  ;;  %v595_v4 = vld [vmem:[%s5948_s1 + $0x11d0] sm:$0xff] }
 0x27f   :  { %3086 = vmatpush1.bf16.xpose.msra.mxu1 %v3085_v5  ;;  %2656 = vmatprep.subr.bf16.mxu0 %v2655_v7  ;;  %v2673_v5 = vpack.c.bf16 %v152_v62, %v139_v60  ;;  %v3105_v7 = vpack.c.bf16 %v568_v0, %v555_v63  ;;  %v3107_v9 = vpack.c.bf16 %v595_v4, %v582_v3  ;;  %v282_v60 = vld [vmem:[%s5948_s1 + $0x808] sm:$0xff]  ;;  %v685_v62 = vld [vmem:[%s5948_s1 + $0x14a0] sm:$0xff]  ;;  %v296_v0 = vld [vmem:[%s5948_s1 + $0x878] sm:$0xff] }
 0x280   :  { %3088 = vmatprep.subr.bf16.mxu1 %v3087_v8  ;;  %v2675_v8 = vpack.c.bf16 %v179_v2, %v166_v1  ;;  %v698_v63 = vld [vmem:[%s5948_s1 + $0x1508] sm:$0xff]  ;;  %v309_v1 = vld [vmem:[%s5948_s1 + $0x8e0] sm:$0xff]  ;;  %v712_v2 = vld [vmem:[%s5948_s1 + $0x1578] sm:$0xff] }
 0x281   :  { %v725_v3 = vld [vmem:[%s5948_s1 + $0x15e0] sm:$0xff] }
 0x285   :  { %1475 = vmatmul.mubr.f32.vlgmr.msra.gmra.mrb[0].mxu0 %v4894_v21 }
 0x286   :  { %2658 = vmatpush1.bf16.xpose.msra.mxu0 %v2657_v18  ;;  %1972 = vmatmul.mubr.f32.vlgmr.msra.gmra.mrb[0].mxu1 %v4894_v21  ;;  %v88_v21 = vld [vmem:[%s5948_s1 + $0x1f8] sm:$0xff]  ;;  %v2677_v18 = vpack.c.bf16 %v178_v11, %v165_v10  ;;  %v711_v11 = vld [vmem:[%s5948_s1 + $0x1570] sm:$0xff] }
 0x287   :  { %3090 = vmatpush1.bf16.xpose.msra.mxu1 %v3089_v19  ;;  %2660 = vmatprep.subr.bf16.mxu0 %v2659_v22  ;;  %v2663_v34 = vpack.c.bf16 %v101_v28, %v88_v21  ;;  %v3109_v19 = vpack.c.bf16 %v594_v55, %v581_v12  ;;  %v2679_v22 = vpack.c.bf16 %v205_v14, %v192_v13  ;;  %v231_v21 = vld [vmem:[%s5948_s1 + $0x670] sm:$0xff]  ;;  %v634_v28 = vld [vmem:[%s5948_s1 + $0x1308] sm:$0xff]  ;;  %v308_v10 = vld [vmem:[%s5948_s1 + $0x8d8] sm:$0xff] }
 0x288   :  { %3092 = vmatprep.subr.bf16.mxu1 %v3091_v23  ;;  %1545 = vmatprep.mubr.f32.mxu0 %v911_v24  ;;  %v3111_v23 = vpack.c.bf16 %v621_v61, %v608_v16  ;;  %v724_v12 = vld [vmem:[%s5948_s1 + $0x15d8] sm:$0xff]  ;;  %v322_v55 = vld [vmem:[%s5948_s1 + $0x948] sm:$0xff]  ;;  %v335_v13 = vld [vmem:[%s5948_s1 + $0x9b0] sm:$0xff] }
 0x289   :  { %2042 = vmatprep.mubr.f32.mxu1 %v911_v24  ;;  %v191_v24 = vld [vmem:[%s5948_s1 + $0x530] sm:$0xff]  ;;  %v738_v14 = vld [vmem:[%s5948_s1 + $0x1648] sm:$0xff] }
 0x28a   :  { %v2681_v31 = vpack.c.bf16 %v204_v25, %v191_v24  ;;  %v751_v16 = vld [vmem:[%s5948_s1 + $0x16b0] sm:$0xff]  ;;  %v334_v24 = vld [vmem:[%s5948_s1 + $0x9a8] sm:$0xff]  ;;  %v737_v25 = vld [vmem:[%s5948_s1 + $0x1640] sm:$0xff] }
 0x28e   :  { %2662 = vmatpush1.bf16.xpose.msra.mxu0 %v2661_v32  ;;  %v3113_v32 = vpack.c.bf16 %v620_v20, %v607_v26  ;;  %v750_v26 = vld [vmem:[%s5948_s1 + $0x16a8] sm:$0xff]  ;;  %v348_v20 = vld [vmem:[%s5948_s1 + $0xa18] sm:$0xff] }
 0x28f   :  { %3094 = vmatpush1.bf16.xpose.msra.mxu1 %v3093_v33  ;;  %2664 = vmatprep.subr.bf16.mxu0 %v2663_v34  ;;  %v2683_v33 = vpack.c.bf16 %v231_v21, %v218_v27  ;;  %v3115_v34 = vpack.c.bf16 %v647_v30, %v634_v28  ;;  %v361_v27 = vld [vmem:[%s5948_s1 + $0xa80] sm:$0xff]  ;;  %v764_v21 = vld [vmem:[%s5948_s1 + $0x1718] sm:$0xff] }
 0x290   :  { %3096 = vmatprep.subr.bf16.mxu1 %v3095_v35  ;;  %v217_v35 = vld [vmem:[%s5948_s1 + $0x600] sm:$0xff] }
 0x291   :  { %v2685_v44 = vpack.c.bf16 %v230_v36, %v217_v35  ;;  %v777_v28 = vld [vmem:[%s5948_s1 + $0x1780] sm:$0xff]  ;;  %v360_v35 = vld [vmem:[%s5948_s1 + $0xa78] sm:$0xff]  ;;  %v763_v36 = vld [vmem:[%s5948_s1 + $0x1710] sm:$0xff] }
 0x296   :  { %2666 = vmatpush1.bf16.xpose.msra.mxu0 %v2665_v45  ;;  %v3117_v45 = vpack.c.bf16 %v646_v39, %v633_v38  ;;  %v776_v38 = vld [vmem:[%s5948_s1 + $0x1778] sm:$0xff]  ;;  %v374_v39 = vld [vmem:[%s5948_s1 + $0xae8] sm:$0xff] }
 0x297   :  { %3098 = vmatpush1.bf16.xpose.msra.mxu1 %v3097_v46  ;;  %2668 = vmatprep.subr.bf16.mxu0 %v2667_v47  ;;  %v2687_v46 = vpack.c.bf16 %v257_v41, %v244_v40  ;;  %v3119_v47 = vpack.c.bf16 %v673_v43, %v660_v42  ;;  %v387_v40 = vld [vmem:[%s5948_s1 + $0xb50] sm:$0xff]  ;;  %v790_v41 = vld [vmem:[%s5948_s1 + $0x17e8] sm:$0xff] }
 0x298   :  { %3100 = vmatprep.subr.bf16.mxu1 %v3099_v48  ;;  %v243_v48 = vld [vmem:[%s5948_s1 + $0x6d0] sm:$0xff] }
 0x299   :  { %v2689_v37 = vpack.c.bf16 %v256_v49, %v243_v48  ;;  %v803_v42 = vld [vmem:[%s5948_s1 + $0x1850] sm:$0xff]  ;;  %v386_v48 = vld [vmem:[%s5948_s1 + $0xb48] sm:$0xff]  ;;  %v789_v49 = vld [vmem:[%s5948_s1 + $0x17e0] sm:$0xff] }
 0x29e   :  { %2670 = vmatpush1.bf16.xpose.msra.mxu0 %v2669_v56  ;;  %v3121_v56 = vpack.c.bf16 %v672_v51, %v659_v50  ;;  %v802_v50 = vld [vmem:[%s5948_s1 + $0x1848] sm:$0xff]  ;;  %v400_v51 = vld [vmem:[%s5948_s1 + $0xbb8] sm:$0xff] }
 0x29f   :  { %3102 = vmatpush1.bf16.xpose.msra.mxu1 %v3101_v57  ;;  %2672 = vmatprep.subr.bf16.mxu0 %v2671_v58  ;;  %v2691_v57 = vpack.c.bf16 %v283_v52, %v270_v29  ;;  %v3123_v58 = vpack.c.bf16 %v699_v54, %v686_v53  ;;  %v413_v29 = vld [vmem:[%s5948_s1 + $0xc20] sm:$0xff]  ;;  %v816_v52 = vld [vmem:[%s5948_s1 + $0x18b8] sm:$0xff] }
 0x2a0   :  { %3104 = vmatprep.subr.bf16.mxu1 %v3103_v59  ;;  %v269_v59 = vld [vmem:[%s5948_s1 + $0x7a0] sm:$0xff] }
 0x2a1   :  { %v2693_v4 = vpack.c.bf16 %v282_v60, %v269_v59  ;;  %v829_v53 = vld [vmem:[%s5948_s1 + $0x1920] sm:$0xff]  ;;  %v412_v59 = vld [vmem:[%s5948_s1 + $0xc18] sm:$0xff]  ;;  %v815_v60 = vld [vmem:[%s5948_s1 + $0x18b0] sm:$0xff] }
 0x2a6   :  { %2674 = vmatpush1.bf16.xpose.msra.mxu0 %v2673_v5  ;;  %v3125_v5 = vpack.c.bf16 %v698_v63, %v685_v62  ;;  %v828_v62 = vld [vmem:[%s5948_s1 + $0x1918] sm:$0xff]  ;;  %v426_v63 = vld [vmem:[%s5948_s1 + $0xc88] sm:$0xff] }
 0x2a7   :  { %3106 = vmatpush1.bf16.xpose.msra.mxu1 %v3105_v7  ;;  %2676 = vmatprep.subr.bf16.mxu0 %v2675_v8  ;;  %v2695_v7 = vpack.c.bf16 %v309_v1, %v296_v0  ;;  %v3127_v8 = vpack.c.bf16 %v725_v3, %v712_v2  ;;  %v439_v0 = vld [vmem:[%s5948_s1 + $0xcf0] sm:$0xff]  ;;  %v842_v1 = vld [vmem:[%s5948_s1 + $0x1988] sm:$0xff] }
 0x2a8   :  { %3108 = vmatprep.subr.bf16.mxu1 %v3107_v9  ;;  %v295_v9 = vld [vmem:[%s5948_s1 + $0x870] sm:$0xff] }
 0x2a9   :  { %v2697_v61 = vpack.c.bf16 %v308_v10, %v295_v9  ;;  %v855_v2 = vld [vmem:[%s5948_s1 + $0x19f0] sm:$0xff]  ;;  %v438_v9 = vld [vmem:[%s5948_s1 + $0xce8] sm:$0xff]  ;;  %v841_v10 = vld [vmem:[%s5948_s1 + $0x1980] sm:$0xff] }
 0x2ae   :  { %2678 = vmatpush1.bf16.xpose.msra.mxu0 %v2677_v18  ;;  %v3129_v18 = vpack.c.bf16 %v724_v12, %v711_v11  ;;  %v854_v11 = vld [vmem:[%s5948_s1 + $0x19e8] sm:$0xff]  ;;  %v245_v12 = vld [vmem:[%s5948_s1 + $0x6e0] sm:$0xff] }
 0x2af   :  { %3110 = vmatpush1.bf16.xpose.msra.mxu1 %v3109_v19  ;;  %2680 = vmatprep.subr.bf16.mxu0 %v2679_v22  ;;  %v2699_v19 = vpack.c.bf16 %v335_v13, %v322_v55  ;;  %v3131_v22 = vpack.c.bf16 %v751_v16, %v738_v14  ;;  %v258_v55 = vld [vmem:[%s5948_s1 + $0x748] sm:$0xff]  ;;  %v661_v13 = vld [vmem:[%s5948_s1 + $0x13e0] sm:$0xff] }
 0x2b0   :  { %3112 = vmatprep.subr.bf16.mxu1 %v3111_v23  ;;  %v321_v23 = vld [vmem:[%s5948_s1 + $0x940] sm:$0xff]  ;;  %v674_v14 = vld [vmem:[%s5948_s1 + $0x1448] sm:$0xff] }
 0x2b1   :  { %v2701_v30 = vpack.c.bf16 %v334_v24, %v321_v23  ;;  %v37_v23 = vld [vmem:[%s5948_s1 + $0x60] sm:$0xff]  ;;  %v50_v24 = vld [vmem:[%s5948_s1 + $0xc8] sm:$0xff] }
 0x2b6   :  { %2682 = vmatpush1.bf16.xpose.msra.mxu0 %v2681_v31  ;;  %v3133_v31 = vpack.c.bf16 %v750_v26, %v737_v25  ;;  %v453_v25 = vld [vmem:[%s5948_s1 + $0xd60] sm:$0xff]  ;;  %v466_v26 = vld [vmem:[%s5948_s1 + $0xdc8] sm:$0xff] }
 0x2b7   :  { %3114 = vmatpush1.bf16.xpose.msra.mxu1 %v3113_v32  ;;  %2684 = vmatprep.subr.bf16.mxu0 %v2683_v33  ;;  %v2703_v32 = vpack.c.bf16 %v361_v27, %v348_v20  ;;  %v3135_v33 = vpack.c.bf16 %v777_v28, %v764_v21  ;;  %v271_v20 = vld [vmem:[%s5948_s1 + $0x7b0] sm:$0xff]  ;;  %v284_v27 = vld [vmem:[%s5948_s1 + $0x818] sm:$0xff] }
 0x2b8   :  { %3116 = vmatprep.subr.bf16.mxu1 %v3115_v34  ;;  %v347_v34 = vld [vmem:[%s5948_s1 + $0xa10] sm:$0xff]  ;;  %v700_v28 = vld [vmem:[%s5948_s1 + $0x1518] sm:$0xff] }
 0x2b9   :  { %v2705_v43 = vpack.c.bf16 %v360_v35, %v347_v34  ;;  %v687_v21 = vld [vmem:[%s5948_s1 + $0x14b0] sm:$0xff]  ;;  %v5697_v34 = vld.sshfl [vmem:[%s5947_s0 + $0x18] sm:$0x3 pattern:$0x76325410] }
 0x2ba   :  { %v63_v35 = vld [vmem:[%s5948_s1 + $0x130] sm:$0xff] }
 0x2be   :  { %2686 = vmatpush1.bf16.xpose.msra.mxu0 %v2685_v44  ;;  %v3137_v44 = vpack.c.bf16 %v776_v38, %v763_v36  ;;  %v76_v36 = vld [vmem:[%s5948_s1 + $0x198] sm:$0xff]  ;;  %v479_v38 = vld [vmem:[%s5948_s1 + $0xe30] sm:$0xff] }
 0x2bf   :  { %3118 = vmatpush1.bf16.xpose.msra.mxu1 %v3117_v45  ;;  %2688 = vmatprep.subr.bf16.mxu0 %v2687_v46  ;;  %v2707_v45 = vpack.c.bf16 %v387_v40, %v374_v39  ;;  %v3139_v46 = vpack.c.bf16 %v803_v42, %v790_v41  ;;  %v297_v39 = vld [vmem:[%s5948_s1 + $0x880] sm:$0xff]  ;;  %v310_v40 = vld [vmem:[%s5948_s1 + $0x8e8] sm:$0xff] }
 0x2c0   :  { %3120 = vmatprep.subr.bf16.mxu1 %v3119_v47  ;;  %v373_v47 = vld [vmem:[%s5948_s1 + $0xae0] sm:$0xff]  ;;  %v726_v42 = vld [vmem:[%s5948_s1 + $0x15e8] sm:$0xff] }
 0x2c1   :  { %v2709_v54 = vpack.c.bf16 %v386_v48, %v373_v47  ;;  %v713_v41 = vld [vmem:[%s5948_s1 + $0x1580] sm:$0xff]  ;;  %v102_v48 = vld [vmem:[%s5948_s1 + $0x268] sm:$0xff] }
 0x2c2   :  { %v89_v47 = vld [vmem:[%s5948_s1 + $0x200] sm:$0xff] }
 0x2c6   :  { %2690 = vmatpush1.bf16.xpose.msra.mxu0 %v2689_v37  ;;  %v3141_v37 = vpack.c.bf16 %v802_v50, %v789_v49  ;;  %v505_v49 = vld [vmem:[%s5948_s1 + $0xf00] sm:$0xff]  ;;  %v518_v50 = vld [vmem:[%s5948_s1 + $0xf68] sm:$0xff] }
 0x2c7   :  { %3122 = vmatpush1.bf16.xpose.msra.mxu1 %v3121_v56  ;;  %2692 = vmatprep.subr.bf16.mxu0 %v2691_v57  ;;  %v2711_v56 = vpack.c.bf16 %v413_v29, %v400_v51  ;;  %v3143_v57 = vpack.c.bf16 %v829_v53, %v816_v52  ;;  %v323_v51 = vld [vmem:[%s5948_s1 + $0x950] sm:$0xff]  ;;  %v336_v29 = vld [vmem:[%s5948_s1 + $0x9b8] sm:$0xff] }
 0x2c8   :  { %3124 = vmatprep.subr.bf16.mxu1 %v3123_v58  ;;  %v399_v58 = vld [vmem:[%s5948_s1 + $0xbb0] sm:$0xff]  ;;  %v752_v53 = vld [vmem:[%s5948_s1 + $0x16b8] sm:$0xff] }
 0x2c9   :  { %v2713_v3 = vpack.c.bf16 %v412_v59, %v399_v58  ;;  %v739_v52 = vld [vmem:[%s5948_s1 + $0x1650] sm:$0xff]  ;;  %v128_v59 = vld [vmem:[%s5948_s1 + $0x338] sm:$0xff] }
 0x2ca   :  { %v115_v58 = vld [vmem:[%s5948_s1 + $0x2d0] sm:$0xff] }
 0x2ce   :  { %2694 = vmatpush1.bf16.xpose.msra.mxu0 %v2693_v4  ;;  %v3145_v4 = vpack.c.bf16 %v828_v62, %v815_v60  ;;  %v531_v60 = vld [vmem:[%s5948_s1 + $0xfd0] sm:$0xff]  ;;  %v544_v62 = vld [vmem:[%s5948_s1 + $0x1038] sm:$0xff] }
 0x2cf   :  { %3126 = vmatpush1.bf16.xpose.msra.mxu1 %v3125_v5  ;;  %2696 = vmatprep.subr.bf16.mxu0 %v2695_v7  ;;  %v2715_v5 = vpack.c.bf16 %v439_v0, %v426_v63  ;;  %v3147_v7 = vpack.c.bf16 %v855_v2, %v842_v1  ;;  %v349_v63 = vld [vmem:[%s5948_s1 + $0xa20] sm:$0xff]  ;;  %v362_v0 = vld [vmem:[%s5948_s1 + $0xa88] sm:$0xff] }
 0x2d0   :  { %3128 = vmatprep.subr.bf16.mxu1 %v3127_v8  ;;  %v425_v8 = vld [vmem:[%s5948_s1 + $0xc80] sm:$0xff]  ;;  %v778_v2 = vld [vmem:[%s5948_s1 + $0x1788] sm:$0xff] }
 0x2d1   :  { %v2717_v16 = vpack.c.bf16 %v438_v9, %v425_v8  ;;  %v765_v1 = vld [vmem:[%s5948_s1 + $0x1720] sm:$0xff]  ;;  %v154_v9 = vld [vmem:[%s5948_s1 + $0x408] sm:$0xff] }
 0x2d2   :  { %v141_v8 = vld [vmem:[%s5948_s1 + $0x3a0] sm:$0xff] }
 0x2d6   :  { %2698 = vmatpush1.bf16.xpose.msra.mxu0 %v2697_v61  ;;  %v3149_v61 = vpack.c.bf16 %v854_v11, %v841_v10  ;;  %v557_v10 = vld [vmem:[%s5948_s1 + $0x10a0] sm:$0xff]  ;;  %v570_v11 = vld [vmem:[%s5948_s1 + $0x1108] sm:$0xff] }
 0x2d7   :  { %3130 = vmatpush1.bf16.xpose.msra.mxu1 %v3129_v18  ;;  %2700 = vmatprep.subr.bf16.mxu0 %v2699_v19  ;;  %v2719_v18 = vpack.c.bf16 %v258_v55, %v245_v12  ;;  %v375_v12 = vld [vmem:[%s5948_s1 + $0xaf0] sm:$0xff]  ;;  %v388_v55 = vld [vmem:[%s5948_s1 + $0xb58] sm:$0xff] }
 0x2d8   :  { %3132 = vmatprep.subr.bf16.mxu1 %v3131_v22  ;;  %v3151_v22 = vpack.c.bf16 %v674_v14, %v661_v13  ;;  %v791_v13 = vld [vmem:[%s5948_s1 + $0x17f0] sm:$0xff]  ;;  %v804_v14 = vld [vmem:[%s5948_s1 + $0x1858] sm:$0xff] }
 0x2de   :  { %2702 = vmatpush1.bf16.xpose.msra.mxu0 %v2701_v30  ;;  %v2722_v30 = vpack.c.bf16 %v50_v24, %v37_v23  ;;  %v167_v23 = vld [vmem:[%s5948_s1 + $0x470] sm:$0xff]  ;;  %v180_v24 = vld [vmem:[%s5948_s1 + $0x4d8] sm:$0xff] }
 0x2df   :  { %3134 = vmatpush1.bf16.xpose.msra.mxu1 %v3133_v31  ;;  %2704 = vmatprep.subr.bf16.mxu0 %v2703_v32  ;;  %v3154_v31 = vpack.c.bf16 %v466_v26, %v453_v25  ;;  %v2725_v32 = vpack.c.bf16 %v284_v27, %v271_v20  ;;  %v583_v25 = vld [vmem:[%s5948_s1 + $0x1170] sm:$0xff]  ;;  %v596_v26 = vld [vmem:[%s5948_s1 + $0x11d8] sm:$0xff]  ;;  %v401_v20 = vld [vmem:[%s5948_s1 + $0xbc0] sm:$0xff] }
 0x2e0   :  { %3136 = vmatprep.subr.bf16.mxu1 %v3135_v33  ;;  %v3157_v33 = vpack.c.bf16 %v700_v28, %v687_v21  ;;  %v414_v27 = vld [vmem:[%s5948_s1 + $0xc28] sm:$0xff]  ;;  %v817_v21 = vld [vmem:[%s5948_s1 + $0x18c0] sm:$0xff] }
 0x2e1   :  { %v830_v28 = vld [vmem:[%s5948_s1 + $0x1928] sm:$0xff] }
 0x2e6   :  { %2706 = vmatpush1.bf16.xpose.msra.mxu0 %v2705_v43  ;;  %v2728_v43 = vpack.c.bf16 %v76_v36, %v63_v35  ;;  %v193_v35 = vld [vmem:[%s5948_s1 + $0x540] sm:$0xff]  ;;  %v206_v36 = vld [vmem:[%s5948_s1 + $0x5a8] sm:$0xff] }
 0x2e7   :  { %3138 = vmatpush1.bf16.xpose.msra.mxu1 %v3137_v44  ;;  %2708 = vmatprep.subr.bf16.mxu0 %v2707_v45  ;;  %v2731_v45 = vpack.c.bf16 %v310_v40, %v297_v39  ;;  %v427_v39 = vld [vmem:[%s5948_s1 + $0xc90] sm:$0xff]  ;;  %v440_v40 = vld [vmem:[%s5948_s1 + $0xcf8] sm:$0xff] }
 0x2e8   :  { %3140 = vmatprep.subr.bf16.mxu1 %v3139_v46  ;;  %v3163_v46 = vpack.c.bf16 %v726_v42, %v713_v41  ;;  %v843_v41 = vld [vmem:[%s5948_s1 + $0x1990] sm:$0xff]  ;;  %v856_v42 = vld [vmem:[%s5948_s1 + $0x19f8] sm:$0xff] }
 0x2ee   :  { %2710 = vmatpush1.bf16.xpose.msra.mxu0 %v2709_v54  ;;  %v2734_v54 = vpack.c.bf16 %v102_v48, %v89_v47  ;;  %v219_v47 = vld [vmem:[%s5948_s1 + $0x610] sm:$0xff]  ;;  %v232_v48 = vld [vmem:[%s5948_s1 + $0x678] sm:$0xff] }
 0x2ef   :  { %3142 = vmatpush1.bf16.xpose.msra.mxu1 %v3141_v37  ;;  %2712 = vmatprep.subr.bf16.mxu0 %v2711_v56  ;;  %v3166_v37 = vpack.c.bf16 %v518_v50, %v505_v49  ;;  %v2737_v56 = vpack.c.bf16 %v336_v29, %v323_v51  ;;  %v635_v49 = vld [vmem:[%s5948_s1 + $0x1310] sm:$0xff]  ;;  %v648_v50 = vld [vmem:[%s5948_s1 + $0x1378] sm:$0xff]  ;;  %v2764_v51 = vpack.c.bf16 %v232_v48, %v219_v47 }
 0x2f0   :  { %3144 = vmatprep.subr.bf16.mxu1 %v3143_v57  ;;  %v3169_v57 = vpack.c.bf16 %v752_v53, %v739_v52  ;;  %v3196_v29 = vpack.c.bf16 %v648_v50, %v635_v49  ;;  %v2152_v52 = vsub.s32 0, %v3406_v6  ;;  %v2156_v53 = vsub.s32 1, %v3406_v6 }
 0x2f6   :  { %2714 = vmatpush1.bf16.xpose.msra.mxu0 %v2713_v3  ;;  %v2740_v3 = vpack.c.bf16 %v128_v59, %v115_v58 }
 0x2f7   :  { %3146 = vmatpush1.bf16.xpose.msra.mxu1 %v3145_v4  ;;  %2716 = vmatprep.subr.bf16.mxu0 %v2715_v5  ;;  %v3172_v4 = vpack.c.bf16 %v544_v62, %v531_v60  ;;  %v2743_v5 = vpack.c.bf16 %v362_v0, %v349_v63 }
 0x2f8   :  { %3148 = vmatprep.subr.bf16.mxu1 %v3147_v7  ;;  %v3175_v7 = vpack.c.bf16 %v778_v2, %v765_v1 }
 0x2fe   :  { %2718 = vmatpush1.bf16.xpose.msra.mxu0 %v2717_v16  ;;  %v2746_v16 = vpack.c.bf16 %v154_v9, %v141_v8 }
 0x2ff   :  { %3150 = vmatpush1.bf16.xpose.msra.mxu1 %v3149_v61  ;;  %2721 = vmatprep.subr.msk.bf16.mxu0 %vm5661_vm1, %v2719_v18  ;;  %v3178_v61 = vpack.c.bf16 %v570_v11, %v557_v10  ;;  %v2749_v18 = vpack.c.bf16 %v388_v55, %v375_v12 }
 0x300   :  { %3153 = vmatprep.subr.msk.bf16.mxu1 %vm5661_vm1, %v3151_v22  ;;  %v3181_v22 = vpack.c.bf16 %v804_v14, %v791_v13 }
 0x305   :  { %1546 = vmatmul.mubr.f32.vlgmr.msra.gmra.mrb[0].mxu0 %v5293_v17 }
 0x306   :  { %2724 = vmatpush3.bf16.xpose.msk.msra.mxu0 %vm5661_vm1, %v2722_v30  ;;  %2043 = vmatmul.mubr.f32.vlgmr.msra.gmra.mrb[0].mxu1 %v5293_v17  ;;  %v492_v17 = vld [vmem:[%s5948_s1 + $0xe98] sm:$0xff]  ;;  %v2752_v30 = vpack.c.bf16 %v180_v24, %v167_v23 }
 0x307   :  { %3156 = vmatpush3.bf16.xpose.msk.msra.mxu1 %vm5661_vm1, %v3154_v31  ;;  %2727 = vmatprep.subr.msk.bf16.mxu0 %vm5661_vm1, %v2725_v32  ;;  %v3160_v44 = vpack.c.bf16 %v492_v17, %v479_v38  ;;  %v3184_v31 = vpack.c.bf16 %v596_v26, %v583_v25  ;;  %v2755_v32 = vpack.c.bf16 %v414_v27, %v401_v20  ;;  %v609_v38 = vld [vmem:[%s5948_s1 + $0x1240] sm:$0xff]  ;;  %v622_v17 = vld [vmem:[%s5948_s1 + $0x12a8] sm:$0xff] }
 0x308   :  { %3159 = vmatprep.subr.msk.bf16.mxu1 %vm5661_vm1, %v3157_v33  ;;  %2299 = vmatprep.mubr.msk.f32.mxu0 %vm931_vm0, %v5697_v34  ;;  %v3187_v33 = vpack.c.bf16 %v830_v28, %v817_v21 }
 0x309   :  { %2333 = vmatprep.mubr.msk.f32.mxu1 %vm931_vm0, %v5697_v34 }
 0x30e   :  { %2730 = vmatpush3.bf16.xpose.msk.msra.mxu0 %vm5661_vm1, %v2728_v43  ;;  %v2758_v43 = vpack.c.bf16 %v206_v36, %v193_v35 }
 0x30f   :  { %3162 = vmatpush3.bf16.xpose.msk.msra.mxu1 %vm5661_vm1, %v3160_v44  ;;  %2733 = vmatprep.subr.msk.bf16.mxu0 %vm5661_vm1, %v2731_v45  ;;  %v3190_v44 = vpack.c.bf16 %v622_v17, %v609_v38  ;;  %v2761_v45 = vpack.c.bf16 %v440_v40, %v427_v39 }
 0x310   :  { %3165 = vmatprep.subr.msk.bf16.mxu1 %vm5661_vm1, %v3163_v46  ;;  %v3193_v46 = vpack.c.bf16 %v856_v42, %v843_v41 }
 0x316   :  { %2736 = vmatpush3.bf16.xpose.msk.msra.mxu0 %vm5661_vm1, %v2734_v54  ;;  %v2160_v54 = vsub.s32 2, %v3406_v6 }
 0x317   :  { %3168 = vmatpush3.bf16.xpose.msk.msra.mxu1 %vm5661_vm1, %v3166_v37  ;;  %2739 = vmatprep.subr.msk.bf16.mxu0 %vm5661_vm1, %v2737_v56  ;;  %v2164_v37 = vsub.s32 3, %v3406_v6  ;;  %v2148_v56 = vld [vmem:[%s5949_s2] sm:$0xf]  ;;  %s3253_s2 = smov [#allocation3]  }
 0x318   :  { %3171 = vmatprep.subr.msk.bf16.mxu1 %vm5661_vm1, %v3169_v57  ;;  %v2153_v19 = vrot.slane %v2148_v56, %v2152_v52  ;;  %v2157_v57 = vrot.slane %v2148_v56, %v2156_v53  ;;  %v2161_v58 = vrot.slane %v2148_v56, %v2160_v54  ;;  %s2192_s7 = sshll.u32 %s3253_s2, 4  ;;  %s2193_s7 = int_to_ptr.vmem [resolvable:$true] %s2192_s7 }
 0x319   :  { %v2165_v59 = vrot.slane %v2148_v56, %v2164_v37  ;;  %s3228_s8 = scalar_lea.vmem %s2193_s7, 128  ;;  %p3233_p1 = scmp.lt.s32.totalorder %s2193_s7, %s2193_s7 }
 0x31a   :  { %v2166_v60 = vcombine.low %v2153_v19, %v2157_v57  ;;  %p3229_p0 = scmp.ne.s32.totalorder %s2193_s7, %s3228_s8  ;;  %p3234_p2 = scmp.lt.s32.totalorder %s3228_s8, %s3228_s8 }
 0x31b   :  { %v2167_v62 = vcombine.low %v2161_v58, %v2165_v59 }
 0x31c   :  { %v2174_v1 = vrot.slane %v2166_v60, %v3433_v15  ;;  %p3235_p3 = por %p3234_p2, %p3233_p1 }
 0x31d   :  { %v2181_v2 = vrot.slane %v2167_v62, %v3433_v15 }
 0x31e   :  { %2742 = vmatpush3.bf16.xpose.msk.msra.mxu0 %vm5661_vm1, %v2740_v3  ;;  %p3236_p4 = pnand %p3235_p3, %p3229_p0 }
 0x31f   :  { %3174 = vmatpush3.bf16.xpose.msk.msra.mxu1 %vm5661_vm1, %v3172_v4  ;;  %2745 = vmatprep.subr.msk.bf16.mxu0 %vm5661_vm1, %v2743_v5  ;;  %v2182_v8 = vcombine.low %v2174_v1, %v2181_v2 }
 0x320   :  { %3177 = vmatprep.subr.msk.bf16.mxu1 %vm5661_vm1, %v3175_v7 }
 0x326   :  { %2748 = vmatpush3.bf16.xpose.msk.msra.mxu0 %vm5661_vm1, %v2746_v16 }
 0x327   :  { %3180 = vmatpush3.bf16.xpose.msk.msra.mxu1 %vm5661_vm1, %v3178_v61  ;;  %2751 = vmatprep.subr.msk.bf16.mxu0 %vm5661_vm1, %v2749_v18 }
 0x328   :  { %3183 = vmatprep.subr.msk.bf16.mxu1 %vm5661_vm1, %v3181_v22 }
 0x32e   :  { %2754 = vmatpush3.bf16.xpose.msk.msra.mxu0 %vm5661_vm1, %v2752_v30 }
 0x32f   :  { %3186 = vmatpush3.bf16.xpose.msk.msra.mxu1 %vm5661_vm1, %v3184_v31  ;;  %2757 = vmatprep.subr.msk.bf16.mxu0 %vm5661_vm1, %v2755_v32 }
 0x330   :  { %3189 = vmatprep.subr.msk.bf16.mxu1 %vm5661_vm1, %v3187_v33 }
 0x336   :  { %2760 = vmatpush3.bf16.xpose.msk.msra.mxu0 %vm5661_vm1, %v2758_v43 }
 0x337   :  { %3192 = vmatpush3.bf16.xpose.msk.msra.mxu1 %vm5661_vm1, %v3190_v44  ;;  %2763 = vmatprep.subr.msk.bf16.mxu0 %vm5661_vm1, %v2761_v45 }
 0x338   :  { %3195 = vmatprep.subr.msk.bf16.mxu1 %vm5661_vm1, %v3193_v46 }
 0x33e   :  { %2766 = vmatpush3.bf16.xpose.msk.msra.mxu0 %vm5661_vm1, %v2764_v51 }
 0x33f   :  { %3198 = vmatpush3.bf16.xpose.msk.msra.mxu1 %vm5661_vm1, %v3196_v29 }
 0x345   :  { %2300 = vmatmul.mubr.msk.f32.vlgmr.msra.gmra.mrb[0].mxu0 %vm931_vm0, %v5697_v34 }
 0x346   :  { %2334 = vmatmul.mubr.msk.f32.vlgmr.msra.gmra.mrb[0].mxu1 %vm931_vm0, %v5697_v34 }
 0x418   :  { %v1618_v63 = vpop.f32.mrb[0].mxu0 }
 0x419   :  { %v2115_v34 = vpop.f32.mrb[0].mxu1  ;;  %v1620_v0 = vpop.f32.mrb[1].mxu0 }
 0x41a   :  { %v2124_v3 = vcombine.low %v1618_v63, %v1620_v0  ;;  %v2117_v4 = vpop.f32.mrb[1].mxu1 }
 0x41b   :  { %v2125_v6 = vcombine.low %v2115_v34, %v2117_v4 }
 0x41c   :  { %v2132_v5 = vrot.slane %v2124_v3, %v3433_v15 }
 0x41d   :  { %v2139_v7 = vrot.slane %v2125_v6, %v3433_v15 }
 0x41f   :  { %v2140_v9 = vcombine.low %v2132_v5, %v2139_v7 }
 0x421   :  { %v2184_v10 = vadd.f32 %v2182_v8, %v2140_v9 }
 0x423   :  { %2185 = vst [vmem:[#allocation3] sm:$0xff] %v2184_v10 }
 0x424   :  { %3239 = shalt.err (!%p3236_p4)
}
 0x425   :  { %s3240_s11 = scalar_lea.hbm %s5950_s3, 128 }
 0x426   :  { %p3241_p5 = scmp.ne.s32.totalorder %s5950_s3, %s3240_s11  ;;  %p3244_p6 = scmp.lt.u32.totalorder %s3240_s11, %s5950_s3 }
 0x428   :  { %p3246_p7 = pnand %p3244_p6, %p3241_p5 }
 0x42a   :  { %3249 = shalt.err (!%p3246_p7)
}
 0x42b   :  { %2195 = dma.vmem_to_hbm [thread:$0]  %s2193_s7, 128, %s5950_s3, [#allocation4]  }
 0x42c   :  { %3250 = dma.done.wait [#allocation4], 128  }
 0x42d   :  { %3251 = vsyncadd [#allocation4], 4294967168 }
 0x42e   :  { %2199 = vsyncpa [#allocation4], 1 }

</bundles_post_ra>
